<compile_context>
chip_gen: v7x
topology: tpu7x:2x2x1
jax: 0.10.0
libtpu: 0.0.40
codegen_flags: <defaults>
</compile_context>

<pallas_src>
import jax
import jax.numpy as jnp
from jax.experimental import pallas as pl
from jax.experimental.pallas import tpu as pltpu


# Packed parameter slab layout (f32, shape (20, 16)):
#   col 0      : w1   (rows 0..9)
#   col 1      : b1   (rows 0..9)
#   cols 2..11 : w2   (20 x 10), column k at col 2+k
#   col 12     : b2   (rows 0..19)
#   col 13     : w3   (rows 0..19)
#   col 14     : b3   (row 0)
#   col 15     : zero padding
def pack_params(w1, b1, w2, b2, w3, b3):
    p = jnp.zeros((20, 16), jnp.float32)
    p = p.at[0:10, 0].set(w1[:, 0])     # w1: PyTorch (10, 1)
    p = p.at[0:10, 1].set(b1)           # b1: (10,)
    p = p.at[0:20, 2:12].set(w2)        # w2: PyTorch (20, 10)
    p = p.at[0:20, 12].set(b2)          # b2: (20,)
    p = p.at[0:20, 13].set(w3[0, :])    # w3: PyTorch (1, 20) -> column
    p = p.at[0, 14].set(b3[0])          # b3: (1,)
    return p


def expert_kernel(x_ref, p_ref, o_ref):
    # Activations are feature-major with batch on lanes: (F, TB).
    x = x_ref[...]                                   # (1, TB)
    p = p_ref[...]                                   # (20, 16) packed params

    w1 = p[0:10, 0:1]                                # (10, 1)
    b1 = p[0:10, 1:2]                                # (10, 1)
    b2 = p[0:20, 12:13]                              # (20, 1)
    w3 = p[0:20, 13:14]                              # (20, 1)
    b3 = p[0:1, 14:15]                               # (1, 1)

    # Layer 1: Linear(1 -> 10) + ReLU. K=1 contraction == broadcast FMA (VPU).
    h1 = jnp.maximum(w1 * x + b1, 0.0)               # (10, TB)

    # Layer 2: Linear(10 -> 20) + ReLU as unrolled exact-f32 rank-1 FMAs on
    # the VPU (MXU utilization for M=20/K=10 would be <1.5%, and f32-HIGHEST
    # would multiply vmatmul pushes 3-6x).  Lane-broadcast w2 column k,
    # sublane-broadcast h1 row k, accumulate.
    acc = p[0:20, 2:3] * h1[0:1, :]                  # (20, TB)
    for k in range(1, 10):
        acc = acc + p[0:20, 2 + k:3 + k] * h1[k:k + 1, :]
    h2 = jnp.maximum(acc + b2, 0.0)                  # (20, TB)

    # Layer 3: Linear(20 -> 1). Elementwise multiply + 20-row sublane
    # reduction (rides the XLU slot), then a lane-dense (1, TB) store.
    y = jnp.sum(w3 * h2, axis=0, keepdims=True) + b3  # (1, TB)
    o_ref[...] = y.astype(o_ref.dtype)


def expert_forward(x, w1, b1, w2, b2, w3, b3, *, tb=None):
    """x: (N, 1) float32 (PyTorch (batch, in_features)). Returns (N, 1)."""
    N, in_f = x.shape
    assert in_f == 1

    if tb is None:
        # Adaptive tile: large enough to amortize the ~0.35 us/step pipeline
        # overhead, ~16+ grid steps for large N (>=8 iterations per v7x TC),
        # capped at 32768 so the per-step VMEM footprint (~136*tb bytes,
        # ~4.5 MiB) stays well inside the scoped VMEM limit on v5e/v6e/v7x.
        tb = min(32768, pl.cdiv(pl.cdiv(N, 16), 1024) * 1024)
    assert tb % 128 == 0

    n_pad = pl.cdiv(N, tb) * tb
    x_lane = x.reshape(1, N)                         # batch onto the lane axis
    if n_pad != N:
        x_lane = jnp.pad(x_lane, ((0, 0), (0, n_pad - N)))

    params = pack_params(w1, b1, w2, b2, w3, b3)     # one tiny (20,16) slab

    out = pl.pallas_call(
        expert_kernel,
        out_shape=jax.ShapeDtypeStruct((1, n_pad), x.dtype),
        grid=(n_pad // tb,),
        in_specs=[
            pl.BlockSpec((1, tb), lambda i: (0, i)),          # x slab (lanes)
            pl.BlockSpec(params.shape, lambda i: (0, 0)),     # VMEM-resident params
        ],
        out_specs=pl.BlockSpec((1, tb), lambda i: (0, i)),    # lane-dense store
        compiler_params=pltpu.CompilerParams(
            dimension_semantics=("parallel",),   # shard batch tiles across TCs
            vmem_limit_bytes=32 << 20,           # safe on v5e/v6e/v7x
        ),
    )(x_lane, params)

    return out[:, :N].reshape(N, 1)


def init_params(key):
    # Deterministic synthetic parameters in PyTorch's native layouts:
    # weights are (out_features, in_features), biases are (out_features,).
    k1, k2, k3, k4, k5, k6 = jax.random.split(key, 6)
    w1 = jax.random.normal(k1, (10, 1), jnp.float32) * 0.5
    b1 = jax.random.normal(k2, (10,), jnp.float32) * 0.1
    w2 = jax.random.normal(k3, (20, 10), jnp.float32) * 0.3
    b2 = jax.random.normal(k4, (20,), jnp.float32) * 0.1
    w3 = jax.random.normal(k5, (1, 20), jnp.float32) * 0.3
    b3 = jax.random.normal(k6, (1,), jnp.float32) * 0.1
    return w1, b1, w2, b2, w3, b3


def reference_forward(x, w1, b1, w2, b2, w3, b3):
    hp = jax.lax.Precision.HIGHEST
    h1 = jnp.maximum(jnp.dot(x, w1.T, precision=hp) + b1, 0.0)   # (N, 10)
    h2 = jnp.maximum(jnp.dot(h1, w2.T, precision=hp) + b2, 0.0)  # (N, 20)
    return jnp.dot(h2, w3.T, precision=hp) + b3                  # (N, 1)


if __name__ == "__main__":
    key = jax.random.PRNGKey(0)
    kx, kp = jax.random.split(key)

    N = 1024                                     # small test batch
    x = jax.random.normal(kx, (N, 1), jnp.float32)
    params = init_params(kp)

    out = expert_forward(x, *params)
    out = jax.block_until_ready(out)

    ref = reference_forward(x, *params)
    assert out.shape == (N, 1)
    assert jnp.allclose(out, ref, atol=1e-5, rtol=1e-5), "mismatch vs reference"

    print("KERNEL_OK")
</pallas_src>

<mosaic_0001>
module attributes {stable_mosaic.version = 11 : i64} {
  func.func @expert_kernel(%arg0: i32, %arg1: memref<1x1024xf32, #tpu.memory_space<vmem>>, %arg2: memref<20x16xf32, #tpu.memory_space<vmem>>, %arg3: memref<1x1024xf32, #tpu.memory_space<vmem>>) attributes {dimension_semantics = [#tpu.dimension_semantics<parallel>], iteration_bounds = array<i64: 1>, scalar_prefetch = 0 : i64, scratch_operands = 0 : i64, tpu.core_type = #tpu.core_type<tc>, window_params = [{transform_indices = @transform_0, window_bounds = array<i64: 1, 1024>}, {pipeline_mode = #tpu.pipeline_mode<synchronous>, transform_indices = @transform_1, window_bounds = array<i64: 20, 16>}, {transform_indices = @transform_2, window_bounds = array<i64: 1, 1024>}]} {
    %c0 = arith.constant 0 : index
    %c0_0 = arith.constant 0 : index
    %0 = vector.load %arg1[%c0, %c0_0] : memref<1x1024xf32, #tpu.memory_space<vmem>>, vector<1x1024xf32>
    %c0_1 = arith.constant 0 : index
    %c0_2 = arith.constant 0 : index
    %1 = vector.load %arg2[%c0_1, %c0_2] : memref<20x16xf32, #tpu.memory_space<vmem>>, vector<20x16xf32>
    %2 = vector.extract_strided_slice %1 {offsets = [0, 0], sizes = [10, 1], strides = [1, 1]} : vector<20x16xf32> to vector<10x1xf32>
    %3 = vector.extract_strided_slice %1 {offsets = [0, 1], sizes = [10, 1], strides = [1, 1]} : vector<20x16xf32> to vector<10x1xf32>
    %4 = vector.extract_strided_slice %1 {offsets = [0, 12], sizes = [20, 1], strides = [1, 1]} : vector<20x16xf32> to vector<20x1xf32>
    %5 = vector.extract_strided_slice %1 {offsets = [0, 13], sizes = [20, 1], strides = [1, 1]} : vector<20x16xf32> to vector<20x1xf32>
    %6 = vector.extract_strided_slice %1 {offsets = [0, 14], sizes = [1, 1], strides = [1, 1]} : vector<20x16xf32> to vector<1x1xf32>
    %7 = vector.broadcast %2 : vector<10x1xf32> to vector<10x1024xf32>
    %8 = vector.broadcast %0 : vector<1x1024xf32> to vector<10x1024xf32>
    %9 = arith.mulf %7, %8 : vector<10x1024xf32>
    %10 = vector.broadcast %3 : vector<10x1xf32> to vector<10x1024xf32>
    %11 = arith.addf %9, %10 : vector<10x1024xf32>
    %cst = arith.constant 0.000000e+00 : f32
    %12 = vector.broadcast %cst : f32 to vector<10x1024xf32>
    %13 = arith.maximumf %11, %12 : vector<10x1024xf32>
    %14 = vector.extract_strided_slice %1 {offsets = [0, 2], sizes = [20, 1], strides = [1, 1]} : vector<20x16xf32> to vector<20x1xf32>
    %15 = vector.extract_strided_slice %13 {offsets = [0, 0], sizes = [1, 1024], strides = [1, 1]} : vector<10x1024xf32> to vector<1x1024xf32>
    %16 = vector.broadcast %14 : vector<20x1xf32> to vector<20x1024xf32>
    %17 = vector.broadcast %15 : vector<1x1024xf32> to vector<20x1024xf32>
    %18 = arith.mulf %16, %17 : vector<20x1024xf32>
    %19 = vector.extract_strided_slice %1 {offsets = [0, 3], sizes = [20, 1], strides = [1, 1]} : vector<20x16xf32> to vector<20x1xf32>
    %20 = vector.extract_strided_slice %13 {offsets = [1, 0], sizes = [1, 1024], strides = [1, 1]} : vector<10x1024xf32> to vector<1x1024xf32>
    %21 = vector.broadcast %19 : vector<20x1xf32> to vector<20x1024xf32>
    %22 = vector.broadcast %20 : vector<1x1024xf32> to vector<20x1024xf32>
    %23 = arith.mulf %21, %22 : vector<20x1024xf32>
    %24 = arith.addf %18, %23 : vector<20x1024xf32>
    %25 = vector.extract_strided_slice %1 {offsets = [0, 4], sizes = [20, 1], strides = [1, 1]} : vector<20x16xf32> to vector<20x1xf32>
    %26 = vector.extract_strided_slice %13 {offsets = [2, 0], sizes = [1, 1024], strides = [1, 1]} : vector<10x1024xf32> to vector<1x1024xf32>
    %27 = vector.broadcast %25 : vector<20x1xf32> to vector<20x1024xf32>
    %28 = vector.broadcast %26 : vector<1x1024xf32> to vector<20x1024xf32>
    %29 = arith.mulf %27, %28 : vector<20x1024xf32>
    %30 = arith.addf %24, %29 : vector<20x1024xf32>
    %31 = vector.extract_strided_slice %1 {offsets = [0, 5], sizes = [20, 1], strides = [1, 1]} : vector<20x16xf32> to vector<20x1xf32>
    %32 = vector.extract_strided_slice %13 {offsets = [3, 0], sizes = [1, 1024], strides = [1, 1]} : vector<10x1024xf32> to vector<1x1024xf32>
    %33 = vector.broadcast %31 : vector<20x1xf32> to vector<20x1024xf32>
    %34 = vector.broadcast %32 : vector<1x1024xf32> to vector<20x1024xf32>
    %35 = arith.mulf %33, %34 : vector<20x1024xf32>
    %36 = arith.addf %30, %35 : vector<20x1024xf32>
    %37 = vector.extract_strided_slice %1 {offsets = [0, 6], sizes = [20, 1], strides = [1, 1]} : vector<20x16xf32> to vector<20x1xf32>
    %38 = vector.extract_strided_slice %13 {offsets = [4, 0], sizes = [1, 1024], strides = [1, 1]} : vector<10x1024xf32> to vector<1x1024xf32>
    %39 = vector.broadcast %37 : vector<20x1xf32> to vector<20x1024xf32>
    %40 = vector.broadcast %38 : vector<1x1024xf32> to vector<20x1024xf32>
    %41 = arith.mulf %39, %40 : vector<20x1024xf32>
    %42 = arith.addf %36, %41 : vector<20x1024xf32>
    %43 = vector.extract_strided_slice %1 {offsets = [0, 7], sizes = [20, 1], strides = [1, 1]} : vector<20x16xf32> to vector<20x1xf32>
    %44 = vector.extract_strided_slice %13 {offsets = [5, 0], sizes = [1, 1024], strides = [1, 1]} : vector<10x1024xf32> to vector<1x1024xf32>
    %45 = vector.broadcast %43 : vector<20x1xf32> to vector<20x1024xf32>
    %46 = vector.broadcast %44 : vector<1x1024xf32> to vector<20x1024xf32>
    %47 = arith.mulf %45, %46 : vector<20x1024xf32>
    %48 = arith.addf %42, %47 : vector<20x1024xf32>
    %49 = vector.extract_strided_slice %1 {offsets = [0, 8], sizes = [20, 1], strides = [1, 1]} : vector<20x16xf32> to vector<20x1xf32>
    %50 = vector.extract_strided_slice %13 {offsets = [6, 0], sizes = [1, 1024], strides = [1, 1]} : vector<10x1024xf32> to vector<1x1024xf32>
    %51 = vector.broadcast %49 : vector<20x1xf32> to vector<20x1024xf32>
    %52 = vector.broadcast %50 : vector<1x1024xf32> to vector<20x1024xf32>
    %53 = arith.mulf %51, %52 : vector<20x1024xf32>
    %54 = arith.addf %48, %53 : vector<20x1024xf32>
    %55 = vector.extract_strided_slice %1 {offsets = [0, 9], sizes = [20, 1], strides = [1, 1]} : vector<20x16xf32> to vector<20x1xf32>
    %56 = vector.extract_strided_slice %13 {offsets = [7, 0], sizes = [1, 1024], strides = [1, 1]} : vector<10x1024xf32> to vector<1x1024xf32>
    %57 = vector.broadcast %55 : vector<20x1xf32> to vector<20x1024xf32>
    %58 = vector.broadcast %56 : vector<1x1024xf32> to vector<20x1024xf32>
    %59 = arith.mulf %57, %58 : vector<20x1024xf32>
    %60 = arith.addf %54, %59 : vector<20x1024xf32>
    %61 = vector.extract_strided_slice %1 {offsets = [0, 10], sizes = [20, 1], strides = [1, 1]} : vector<20x16xf32> to vector<20x1xf32>
    %62 = vector.extract_strided_slice %13 {offsets = [8, 0], sizes = [1, 1024], strides = [1, 1]} : vector<10x1024xf32> to vector<1x1024xf32>
    %63 = vector.broadcast %61 : vector<20x1xf32> to vector<20x1024xf32>
    %64 = vector.broadcast %62 : vector<1x1024xf32> to vector<20x1024xf32>
    %65 = arith.mulf %63, %64 : vector<20x1024xf32>
    %66 = arith.addf %60, %65 : vector<20x1024xf32>
    %67 = vector.extract_strided_slice %1 {offsets = [0, 11], sizes = [20, 1], strides = [1, 1]} : vector<20x16xf32> to vector<20x1xf32>
    %68 = vector.extract_strided_slice %13 {offsets = [9, 0], sizes = [1, 1024], strides = [1, 1]} : vector<10x1024xf32> to vector<1x1024xf32>
    %69 = vector.broadcast %67 : vector<20x1xf32> to vector<20x1024xf32>
    %70 = vector.broadcast %68 : vector<1x1024xf32> to vector<20x1024xf32>
    %71 = arith.mulf %69, %70 : vector<20x1024xf32>
    %72 = arith.addf %66, %71 : vector<20x1024xf32>
    %73 = vector.broadcast %4 : vector<20x1xf32> to vector<20x1024xf32>
    %74 = arith.addf %72, %73 : vector<20x1024xf32>
    %cst_3 = arith.constant 0.000000e+00 : f32
    %75 = vector.broadcast %cst_3 : f32 to vector<20x1024xf32>
    %76 = arith.maximumf %74, %75 : vector<20x1024xf32>
    %77 = vector.broadcast %5 : vector<20x1xf32> to vector<20x1024xf32>
    %78 = arith.mulf %77, %76 : vector<20x1024xf32>
    %cst_4 = arith.constant dense<0.000000e+00> : vector<1024xf32>
    %79 = vector.multi_reduction <add>, %78, %cst_4 [0] : vector<20x1024xf32> to vector<1024xf32>
    %80 = vector.shape_cast %79 : vector<1024xf32> to vector<1x1024xf32>
    %81 = vector.broadcast %6 : vector<1x1xf32> to vector<1x1024xf32>
    %82 = arith.addf %80, %81 : vector<1x1024xf32>
    %c0_5 = arith.constant 0 : index
    %c0_6 = arith.constant 0 : index
    %83 = vector.load %arg3[%c0_5, %c0_6] : memref<1x1024xf32, #tpu.memory_space<vmem>>, vector<1x1024xf32>
    tpu.vector_store %arg3[%c0_5, %c0_6], %82 {strides = array<i32>} : memref<1x1024xf32, #tpu.memory_space<vmem>>, vector<1x1024xf32>,
    return
  }
  func.func @transform_0(%arg0: i32) -> (i32, i32) {
    %c0_i32 = arith.constant 0 : i32
    %c0_i32_0 = arith.constant 0 : i32
    return %c0_i32, %arg0 : i32, i32
  }
  func.func @transform_1(%arg0: i32) -> (i32, i32) {
    %c0_i32 = arith.constant 0 : i32
    %c0_i32_0 = arith.constant 0 : i32
    %c0_i32_1 = arith.constant 0 : i32
    return %c0_i32, %c0_i32_0 : i32, i32
  }
  func.func @transform_2(%arg0: i32) -> (i32, i32) {
    %c0_i32 = arith.constant 0 : i32
    %c0_i32_0 = arith.constant 0 : i32
    return %c0_i32, %arg0 : i32, i32
  }
}

</mosaic_0001>

<bundles_post_ra>
// kernel: tpu_custom_call.1
= control target key start
LH: loop header
LB: loop body
LE: loop exit
PB: predicated region body
PF: predicated region fallthrough
CT: control target
= control target key end

     0   :  { %v1342_v1 = vmov 1   ;;  %v1343_v2 = vmov 0   ;;  %s2424_s0 = inlined_call_operand.vmem [shape: f32[1,1024], index: 0, kind: input, shape index: {}]   ;;  %s2425_s1 = inlined_call_operand.vmem [shape: f32[20,16], index: 1, kind: input, shape index: {}]   ;;  %s2426_s2 = inlined_call_operand.hbm [shape: f32[1,1024], index: 2, kind: output, shape index: {}]  }
   0x1   :  { %v1377_v0 = vld [vmem:[%s2425_s1] sm:$0xff]  ;;  %1292 = vset.pattern.permute.xlu1 %v1342_v1  ;;  %1291 = vset.pattern.permute.xlu0 %v1343_v2  ;;  %v1384_v3 = vld [vmem:[%s2425_s1 + $0x8] sm:$0xff] }
   0x2   :  { %84 = vperm.xlu1 %1292, %v1377_v0   ;;  %18 = vperm.xlu0 %1291, %v1377_v0  }
   0x3   :  { %7 = vsyncpa [#allocation3], 0  ;;  %v1344_v4 = vmov 2   ;;  %v1393_v5 = vld [vmem:[%s2425_s1 + $0x10] sm:$0xf]  ;;  %v1345_v6 = vmov 3   ;;  %v27_v18 = vlaneseq }
   0x4   :  { %v1346_v7 = vmov 4   ;;  %v1347_v8 = vmov 5   ;;  %v1348_v9 = vmov 6   ;;  %v1349_v10 = vmov 7   ;;  %v12_v28 = vld [vmem:[%s2424_s0] sm:$0xff]  ;;  %s1358_s0 = smov [#allocation2]  }
   0x5   :  { %v1350_v11 = vmov 8   ;;  %v1351_v12 = vmov 9   ;;  %v1352_v13 = vmov 10   ;;  %v1353_v14 = vmov 11   ;;  %s1266_s16 = sshll.u32 %s1358_s0, 4  ;;  %s1267_s16 = int_to_ptr.vmem [resolvable:$true] %s1266_s16 }
   0x6   :  { %88 = vperm.xlu1 %1292, %v1384_v3   ;;  %23 = vperm.xlu0 %1291, %v1384_v3   ;;  %v1354_v15 = vmov 12   ;;  %v1355_v16 = vmov 13   ;;  %v1356_v17 = vmov 14   ;;  %v1430_v19 = vshrl.u32 %v27_v18, 7  ;;  %s1318_s17 = scalar_lea.vmem %s1267_s16, 128  ;;  %p1323_p1 = scmp.lt.s32.totalorder %s1267_s16, %s1267_s16 }
   0x7   :  { %vm1117_vm0 = vcmask 1043456   ;;  %p1319_p0 = scmp.ne.s32.totalorder %s1267_s16, %s1318_s17  ;;  %p1324_p2 = scmp.lt.s32.totalorder %s1318_s17, %s1318_s17 }
   0x8   :  { %2538 = vst [vmem:[#allocation5_spill] sm:$0xff] %v1430_v19  ;;  %v1433_v20 = vsub.s32 0, %v1430_v19  ;;  %v1436_v21 = vsub.s32 1, %v1430_v19  ;;  %v1439_v22 = vsub.s32 2, %v1430_v19  ;;  %v1442_v23 = vsub.s32 3, %v1430_v19 }
   0x9   :  { %v1445_v24 = vsub.s32 4, %v1430_v19  ;;  %v1448_v25 = vsub.s32 5, %v1430_v19  ;;  %v1451_v26 = vsub.s32 6, %v1430_v19  ;;  %v1454_v27 = vsub.s32 7, %v1430_v19  ;;  %p1325_p3 = por %p1324_p2, %p1323_p1 }
   0xa   :  { %1294 = vset.pattern.permute.xlu1 %v1344_v4  ;;  %1293 = vset.pattern.permute.xlu0 %v1344_v4  ;;  %2539 = vst [vmem:[#allocation6_spill] sm:$0xff] %v1433_v20  ;;  %2540 = vst [vmem:[#allocation7_spill] sm:$0xff] %v1436_v21  ;;  %v30_v29 = vrot.slane %v12_v28, %v1433_v20  ;;  %v34_v30 = vrot.slane %v12_v28, %v1436_v21 }
   0xb   :  { %128 = vperm.xlu1 %1294, %v1384_v3   ;;  %124 = vperm.xlu0 %1293, %v1377_v0   ;;  %2541 = vst [vmem:[#allocation8_spill] sm:$0xff] %v1442_v23  ;;  %2542 = vst [vmem:[#allocation9_spill] sm:$0xff] %v1445_v24  ;;  %v38_v31 = vrot.slane %v12_v28, %v1439_v22  ;;  %v42_v32 = vrot.slane %v12_v28, %v1442_v23  ;;  %p1326_p4 = pnand %p1325_p3, %p1319_p0 }
   0xc   :  { %2543 = vst [vmem:[#allocation10_spill] sm:$0xff] %v1448_v25  ;;  %2544 = vst [vmem:[#allocation11_spill] sm:$0xff] %v1451_v26  ;;  %v46_v33 = vrot.slane %v12_v28, %v1445_v24  ;;  %v50_v34 = vrot.slane %v12_v28, %v1448_v25  ;;  %v54_v35 = vrot.slane %v12_v28, %v1451_v26 }
   0xd   :  { %2545 = vst [vmem:[#allocation12_spill] sm:$0xff] %v1454_v27  ;;  %v58_v36 = vrot.slane %v12_v28, %v1454_v27 }
   0xf   :  { %133 = vperm.xlu1 %1294, %v1393_v5   ;;  %1295 = vset.pattern.permute.xlu0 %v1345_v6 }
  0x10   :  { %193 = vperm.xlu0 %1295, %v1377_v0  }
  0x13   :  { %1296 = vset.pattern.permute.xlu1 %v1345_v6 }
  0x14   :  { %197 = vperm.xlu1 %1296, %v1384_v3   ;;  %1297 = vset.pattern.permute.xlu0 %v1346_v7 }
  0x15   :  { %285 = vperm.xlu0 %1297, %v1377_v0  }
  0x18   :  { %201 = vperm.xlu1 %1296, %v1393_v5  }
  0x19   :  { %1299 = vset.pattern.permute.xlu0 %v1347_v8 }
  0x1a   :  { %377 = vperm.xlu0 %1299, %v1377_v0  }
  0x1c   :  { %1298 = vset.pattern.permute.xlu1 %v1346_v7 }
  0x1d   :  { %289 = vperm.xlu1 %1298, %v1384_v3  }
  0x1e   :  { %1301 = vset.pattern.permute.xlu0 %v1348_v9 }
  0x1f   :  { %469 = vperm.xlu0 %1301, %v1377_v0  }
  0x21   :  { %293 = vperm.xlu1 %1298, %v1393_v5  }
  0x23   :  { %1303 = vset.pattern.permute.xlu0 %v1349_v10 }
  0x24   :  { %561 = vperm.xlu0 %1303, %v1377_v0  }
  0x25   :  { %1300 = vset.pattern.permute.xlu1 %v1347_v8 }
  0x26   :  { %381 = vperm.xlu1 %1300, %v1384_v3  }
  0x28   :  { %1305 = vset.pattern.permute.xlu0 %v1350_v11 }
  0x29   :  { %653 = vperm.xlu0 %1305, %v1377_v0  }
  0x2a   :  { %385 = vperm.xlu1 %1300, %v1393_v5  }
  0x2d   :  { %1307 = vset.pattern.permute.xlu0 %v1351_v12 }
  0x2e   :  { %1302 = vset.pattern.permute.xlu1 %v1348_v9  ;;  %745 = vperm.xlu0 %1307, %v1377_v0  }
  0x2f   :  { %473 = vperm.xlu1 %1302, %v1384_v3  }
  0x32   :  { %1309 = vset.pattern.permute.xlu0 %v1352_v13 }
  0x33   :  { %477 = vperm.xlu1 %1302, %v1393_v5   ;;  %837 = vperm.xlu0 %1309, %v1377_v0  }
  0x37   :  { %1304 = vset.pattern.permute.xlu1 %v1349_v10  ;;  %1311 = vset.pattern.permute.xlu0 %v1353_v14 }
  0x38   :  { %565 = vperm.xlu1 %1304, %v1384_v3   ;;  %929 = vperm.xlu0 %1311, %v1377_v0  }
  0x3c   :  { %569 = vperm.xlu1 %1304, %v1393_v5   ;;  %1313 = vset.pattern.permute.xlu0 %v1354_v15 }
  0x3d   :  { %1021 = vperm.xlu0 %1313, %v1377_v0  }
  0x40   :  { %1306 = vset.pattern.permute.xlu1 %v1350_v11 }
  0x41   :  { %657 = vperm.xlu1 %1306, %v1384_v3   ;;  %1315 = vset.pattern.permute.xlu0 %v1355_v16 }
  0x42   :  { %1081 = vperm.xlu0 %1315, %v1377_v0  }
  0x45   :  { %661 = vperm.xlu1 %1306, %v1393_v5  }
  0x46   :  { %1317 = vset.pattern.permute.xlu0 %v1356_v17 }
  0x47   :  { %1190 = vperm.xlu0 %1317, %v1377_v0  }
  0x49   :  { %1308 = vset.pattern.permute.xlu1 %v1351_v12 }
  0x4a   :  { %749 = vperm.xlu1 %1308, %v1384_v3  }
  0x4e   :  { %753 = vperm.xlu1 %1308, %v1393_v5  }
  0x52   :  { %1310 = vset.pattern.permute.xlu1 %v1352_v13 }
  0x53   :  { %841 = vperm.xlu1 %1310, %v1384_v3  }
  0x57   :  { %845 = vperm.xlu1 %1310, %v1393_v5  }
  0x5b   :  { %1312 = vset.pattern.permute.xlu1 %v1353_v14 }
  0x5c   :  { %933 = vperm.xlu1 %1312, %v1384_v3  }
  0x60   :  { %937 = vperm.xlu1 %1312, %v1393_v5  }
  0x64   :  { %1314 = vset.pattern.permute.xlu1 %v1354_v15 }
  0x65   :  { %1025 = vperm.xlu1 %1314, %v1384_v3  }
  0x69   :  { %1029 = vperm.xlu1 %1314, %v1393_v5  }
  0x6d   :  { %1316 = vset.pattern.permute.xlu1 %v1355_v16 }
  0x6e   :  { %1085 = vperm.xlu1 %1316, %v1384_v3  }
  0x72   :  { %1089 = vperm.xlu1 %1316, %v1393_v5  }
  0x81   :  { %v85_v37 = vpop.permute.xlu1 %84  ;;  %v19_v38 = vpop.permute.xlu0 %18 }
  0x82   :  { %v67_v39 = vmul.f32 %v30_v29, %v19_v38  ;;  %v68_v40 = vmul.f32 %v34_v30, %v19_v38  ;;  %v69_v41 = vmul.f32 %v38_v31, %v19_v38  ;;  %v70_v42 = vmul.f32 %v42_v32, %v19_v38 }
  0x83   :  { %v71_v43 = vmul.f32 %v46_v33, %v19_v38  ;;  %v72_v44 = vmul.f32 %v50_v34, %v19_v38  ;;  %v73_v45 = vmul.f32 %v54_v35, %v19_v38  ;;  %v74_v46 = vmul.f32 %v58_v36, %v19_v38 }
  0x84   :  { %v91_v47 = vadd.f32 %v85_v37, %v67_v39  ;;  %v92_v48 = vadd.f32 %v85_v37, %v68_v40  ;;  %v93_v49 = vadd.f32 %v85_v37, %v69_v41  ;;  %v94_v50 = vadd.f32 %v85_v37, %v70_v42 }
  0x85   :  { %v95_v51 = vadd.f32 %v85_v37, %v71_v43  ;;  %v96_v52 = vadd.f32 %v85_v37, %v72_v44  ;;  %v97_v53 = vadd.f32 %v85_v37, %v73_v45  ;;  %v98_v54 = vadd.f32 %v85_v37, %v74_v46  ;;  %v89_v55 = vpop.permute.xlu1 %88  ;;  %v24_v56 = vpop.permute.xlu0 %23 }
  0x86   :  { %v1467_v57 = vmax.f32 %v91_v47, 0.0  ;;  %v1469_v58 = vmax.f32 %v92_v48, 0.0  ;;  %v1471_v59 = vmax.f32 %v93_v49, 0.0  ;;  %v1473_v60 = vmax.f32 %v94_v50, 0.0 }
  0x87   :  { %v1475_v61 = vmax.f32 %v95_v51, 0.0  ;;  %v1477_v62 = vmax.f32 %v96_v52, 0.0  ;;  %v1479_v63 = vmax.f32 %v97_v53, 0.0  ;;  %v1481_v0 = vmax.f32 %v98_v54, 0.0 }
  0x88   :  { %v75_v1 = vmul.f32 %v30_v29, %v24_v56  ;;  %v76_v2 = vmul.f32 %v34_v30, %v24_v56  ;;  %v77_v3 = vmul.f32 %v38_v31, %v24_v56  ;;  %v78_v4 = vmul.f32 %v42_v32, %v24_v56 }
  0x89   :  { %v79_v5 = vmul.f32 %v46_v33, %v24_v56  ;;  %v80_v6 = vmul.f32 %v50_v34, %v24_v56  ;;  %v81_v7 = vmul.f32 %v54_v35, %v24_v56  ;;  %v82_v8 = vmul.f32 %v58_v36, %v24_v56 }
  0x8a   :  { %v1483_v9 = vadd.f32 %v89_v55, %v75_v1  ;;  %v1485_v10 = vadd.f32 %v89_v55, %v76_v2  ;;  %v1487_v11 = vadd.f32 %v89_v55, %v77_v3  ;;  %v1489_v12 = vadd.f32 %v89_v55, %v78_v4  ;;  %v129_v17 = vpop.permute.xlu1 %128  ;;  %v125_v43 = vpop.permute.xlu0 %124 }
  0x8b   :  { %v1491_v13 = vadd.f32 %v89_v55, %v79_v5  ;;  %v1493_v14 = vadd.f32 %v89_v55, %v80_v6  ;;  %v1495_v15 = vadd.f32 %v89_v55, %v81_v7  ;;  %v1497_v16 = vadd.f32 %v89_v55, %v82_v8 }
  0x8c   :  { %2546 = vst [vmem:[#allocation13_spill] sm:$0xff] %v1483_v9  ;;  %2547 = vst [vmem:[#allocation14_spill] sm:$0xff] %v1485_v10  ;;  %v139_v35 = vrot.slane %v1467_v57, %v1433_v20  ;;  %v143_v36 = vrot.slane %v1469_v58, %v1433_v20  ;;  %v147_v37 = vrot.slane %v1471_v59, %v1433_v20 }
  0x8d   :  { %2548 = vst [vmem:[#allocation15_spill] sm:$0xff] %v1487_v11  ;;  %2549 = vst [vmem:[#allocation16_spill] sm:$0xff] %v1489_v12  ;;  %v151_v38 = vrot.slane %v1473_v60, %v1433_v20  ;;  %v155_v39 = vrot.slane %v1475_v61, %v1433_v20  ;;  %v159_v40 = vrot.slane %v1477_v62, %v1433_v20 }
  0x8e   :  { %2550 = vst [vmem:[#allocation17_spill] sm:$0xff] %v1491_v13  ;;  %2551 = vst [vmem:[#allocation18_spill] sm:$0xff] %v1493_v14  ;;  %v163_v41 = vrot.slane %v1479_v63, %v1433_v20  ;;  %v167_v42 = vrot.slane %v1481_v0, %v1433_v20  ;;  %v176_v44 = vmul.f32 %v139_v35, %v129_v17  ;;  %v134_v52 = vpop.permute.xlu1 %133 }
  0x8f   :  { %2552 = vst [vmem:[#allocation19_spill] sm:$0xff] %v1495_v15  ;;  %2553 = vst [vmem:[#allocation20_spill] sm:$0xff] %v1497_v16  ;;  %v177_v45 = vmul.f32 %v143_v36, %v129_v17  ;;  %v178_v46 = vmul.f32 %v147_v37, %v129_v17  ;;  %v179_v47 = vmul.f32 %v151_v38, %v129_v17  ;;  %v194_v31 = vpop.permute.xlu0 %193 }
  0x90   :  { %v180_v48 = vmul.f32 %v155_v39, %v129_v17  ;;  %v181_v49 = vmul.f32 %v159_v40, %v129_v17  ;;  %v182_v50 = vmul.f32 %v163_v41, %v129_v17  ;;  %v183_v51 = vmul.f32 %v167_v42, %v129_v17 }
  0x91   :  { %v168_v53 = vmul.f32 %v139_v35, %v125_v43  ;;  %v169_v54 = vmul.f32 %v143_v36, %v125_v43  ;;  %v170_v55 = vmul.f32 %v147_v37, %v125_v43  ;;  %v171_v56 = vmul.f32 %v151_v38, %v125_v43 }
  0x92   :  { %v172_v1 = vmul.f32 %v155_v39, %v125_v43  ;;  %v173_v2 = vmul.f32 %v159_v40, %v125_v43  ;;  %v174_v3 = vmul.f32 %v163_v41, %v125_v43  ;;  %v175_v4 = vmul.f32 %v167_v42, %v125_v43 }
  0x93   :  { %v1523_v5 = vmul.f32 %v139_v35, %v134_v52  ;;  %v1525_v6 = vmul.f32 %v143_v36, %v134_v52  ;;  %v1527_v7 = vmul.f32 %v147_v37, %v134_v52  ;;  %v1529_v8 = vmul.f32 %v151_v38, %v134_v52  ;;  %v198_v15 = vpop.permute.xlu1 %197 }
  0x94   :  { %v1531_v34 = vmul.f32 %v155_v39, %v134_v52  ;;  %v1533_v17 = vmul.f32 %v159_v40, %v134_v52  ;;  %v1535_v33 = vmul.f32 %v163_v41, %v134_v52  ;;  %v1537_v32 = vmul.f32 %v167_v42, %v134_v52 }
  0x95   :  { %v1541_v43 = vrot.slane %v1467_v57, %v1436_v21  ;;  %v1545_v35 = vrot.slane %v1469_v58, %v1436_v21  ;;  %v1549_v36 = vrot.slane %v1471_v59, %v1436_v21  ;;  %v1553_v37 = vrot.slane %v1473_v60, %v1436_v21 }
  0x96   :  { %v1557_v38 = vrot.slane %v1475_v61, %v1436_v21  ;;  %v1561_v39 = vrot.slane %v1477_v62, %v1436_v21  ;;  %v1565_v40 = vrot.slane %v1479_v63, %v1436_v21  ;;  %v1569_v41 = vrot.slane %v1481_v0, %v1436_v21 }
  0x97   :  { %v236_v42 = vmul.f32 %v1541_v43, %v194_v31  ;;  %v237_v52 = vmul.f32 %v1545_v35, %v194_v31  ;;  %v238_v30 = vmul.f32 %v1549_v36, %v194_v31  ;;  %v239_v29 = vmul.f32 %v1553_v37, %v194_v31 }
  0x98   :  { %v240_v28 = vmul.f32 %v1557_v38, %v194_v31  ;;  %v241_v18 = vmul.f32 %v1561_v39, %v194_v31  ;;  %v242_v19 = vmul.f32 %v1565_v40, %v194_v31  ;;  %v243_v16 = vmul.f32 %v1569_v41, %v194_v31 }
  0x99   :  { %v260_v14 = vadd.f32 %v236_v42, %v168_v53  ;;  %v261_v21 = vadd.f32 %v237_v52, %v169_v54  ;;  %v262_v13 = vadd.f32 %v238_v30, %v170_v55  ;;  %v263_v12 = vadd.f32 %v239_v29, %v171_v56 }
  0x9a   :  { %v264_v11 = vadd.f32 %v240_v28, %v172_v1  ;;  %v265_v10 = vadd.f32 %v241_v18, %v173_v2  ;;  %v266_v9 = vadd.f32 %v242_v19, %v174_v3  ;;  %v267_v20 = vadd.f32 %v243_v16, %v175_v4  ;;  %v286_v1 = vpop.permute.xlu0 %285  ;;  %v202_v4 = vpop.permute.xlu1 %201 }
  0x9b   :  { %v244_v27 = vmul.f32 %v1541_v43, %v198_v15  ;;  %v245_v26 = vmul.f32 %v1545_v35, %v198_v15  ;;  %v246_v25 = vmul.f32 %v1549_v36, %v198_v15  ;;  %v247_v24 = vmul.f32 %v1553_v37, %v198_v15 }
  0x9c   :  { %v248_v23 = vmul.f32 %v1557_v38, %v198_v15  ;;  %v249_v31 = vmul.f32 %v1561_v39, %v198_v15  ;;  %v250_v53 = vmul.f32 %v1565_v40, %v198_v15  ;;  %v251_v29 = vmul.f32 %v1569_v41, %v198_v15 }
  0x9d   :  { %v1587_v28 = vadd.f32 %v244_v27, %v176_v44  ;;  %v1589_v19 = vadd.f32 %v245_v26, %v177_v45  ;;  %v1591_v16 = vadd.f32 %v246_v25, %v178_v46  ;;  %v1593_v18 = vadd.f32 %v247_v24, %v179_v47 }
  0x9e   :  { %v1595_v30 = vadd.f32 %v248_v23, %v180_v48  ;;  %v1597_v54 = vadd.f32 %v249_v31, %v181_v49  ;;  %v1599_v55 = vadd.f32 %v250_v53, %v182_v50  ;;  %v1601_v56 = vadd.f32 %v251_v29, %v183_v51 }
  0x9f   :  { %2554 = vst [vmem:[#allocation21_spill] sm:$0xff] %v1589_v19  ;;  %2555 = vst [vmem:[#allocation22_spill] sm:$0xff] %v1591_v16  ;;  %v1605_v15 = vrot.slane %v1467_v57, %v1439_v22  ;;  %v1609_v26 = vrot.slane %v1469_v58, %v1439_v22  ;;  %v1613_v24 = vrot.slane %v1471_v59, %v1439_v22 }
  0xa0   :  { %2556 = vst [vmem:[#allocation23_spill] sm:$0xff] %v1593_v18  ;;  %2557 = vst [vmem:[#allocation24_spill] sm:$0xff] %v1595_v30  ;;  %v1617_v23 = vrot.slane %v1473_v60, %v1439_v22  ;;  %v1621_v25 = vrot.slane %v1475_v61, %v1439_v22  ;;  %v1625_v27 = vrot.slane %v1477_v62, %v1439_v22 }
  0xa1   :  { %2558 = vst [vmem:[#allocation25_spill] sm:$0xff] %v1597_v54  ;;  %2559 = vst [vmem:[#allocation26_spill] sm:$0xff] %v1599_v55  ;;  %v1629_v44 = vrot.slane %v1479_v63, %v1439_v22  ;;  %v1633_v45 = vrot.slane %v1481_v0, %v1439_v22  ;;  %v328_v46 = vmul.f32 %v1605_v15, %v286_v1 }
  0xa2   :  { %2560 = vst [vmem:[#allocation27_spill] sm:$0xff] %v1601_v56  ;;  %v329_v47 = vmul.f32 %v1609_v26, %v286_v1  ;;  %v330_v48 = vmul.f32 %v1613_v24, %v286_v1  ;;  %v331_v49 = vmul.f32 %v1617_v23, %v286_v1  ;;  %v332_v50 = vmul.f32 %v1621_v25, %v286_v1 }
  0xa3   :  { %v333_v51 = vmul.f32 %v1625_v27, %v286_v1  ;;  %v334_v2 = vmul.f32 %v1629_v44, %v286_v1  ;;  %v335_v3 = vmul.f32 %v1633_v45, %v286_v1  ;;  %v352_v42 = vadd.f32 %v328_v46, %v260_v14 }
  0xa4   :  { %v353_v22 = vadd.f32 %v329_v47, %v261_v21  ;;  %v354_v52 = vadd.f32 %v330_v48, %v262_v13  ;;  %v355_v31 = vadd.f32 %v331_v49, %v263_v12  ;;  %v356_v53 = vadd.f32 %v332_v50, %v264_v11 }
  0xa5   :  { %v357_v29 = vadd.f32 %v333_v51, %v265_v10  ;;  %v358_v56 = vadd.f32 %v334_v2, %v266_v9  ;;  %v359_v55 = vadd.f32 %v335_v3, %v267_v20  ;;  %v252_v54 = vmul.f32 %v1541_v43, %v202_v4 }
  0xa6   :  { %v253_v30 = vmul.f32 %v1545_v35, %v202_v4  ;;  %v254_v18 = vmul.f32 %v1549_v36, %v202_v4  ;;  %v255_v16 = vmul.f32 %v1553_v37, %v202_v4  ;;  %v256_v19 = vmul.f32 %v1557_v38, %v202_v4  ;;  %v2561_v35 = vld [vmem:[#allocation8_spill] sm:$0xff] }
  0xa7   :  { %v257_v1 = vmul.f32 %v1561_v39, %v202_v4  ;;  %v258_v21 = vmul.f32 %v1565_v40, %v202_v4  ;;  %v259_v12 = vmul.f32 %v1569_v41, %v202_v4  ;;  %v1652_v10 = vadd.f32 %v252_v54, %v1523_v5  ;;  %v290_v54 = vpop.permute.xlu1 %289 }
  0xa8   :  { %v1655_v20 = vadd.f32 %v253_v30, %v1525_v6  ;;  %v1658_v9 = vadd.f32 %v254_v18, %v1527_v7  ;;  %v1661_v11 = vadd.f32 %v255_v16, %v1529_v8  ;;  %v1664_v13 = vadd.f32 %v256_v19, %v1531_v34  ;;  %v378_v6 = vpop.permute.xlu0 %377 }
  0xa9   :  { %v1667_v14 = vadd.f32 %v257_v1, %v1533_v17  ;;  %v1670_v43 = vadd.f32 %v258_v21, %v1535_v33  ;;  %v1673_v5 = vadd.f32 %v259_v12, %v1537_v32  ;;  %v1677_v7 = vrot.slane %v1467_v57, %v2561_v35 }
  0xaa   :  { %v1681_v8 = vrot.slane %v1469_v58, %v2561_v35  ;;  %v1685_v34 = vrot.slane %v1471_v59, %v2561_v35  ;;  %v1689_v33 = vrot.slane %v1473_v60, %v2561_v35  ;;  %v1693_v32 = vrot.slane %v1475_v61, %v2561_v35 }
  0xab   :  { %v1697_v17 = vrot.slane %v1477_v62, %v2561_v35  ;;  %v1701_v36 = vrot.slane %v1479_v63, %v2561_v35  ;;  %v1705_v37 = vrot.slane %v1481_v0, %v2561_v35  ;;  %v420_v38 = vmul.f32 %v1677_v7, %v378_v6 }
  0xac   :  { %v421_v39 = vmul.f32 %v1681_v8, %v378_v6  ;;  %v422_v40 = vmul.f32 %v1685_v34, %v378_v6  ;;  %v423_v41 = vmul.f32 %v1689_v33, %v378_v6  ;;  %v424_v19 = vmul.f32 %v1693_v32, %v378_v6 }
  0xad   :  { %2562 = vst [vmem:[#allocation8_spill] sm:$0xff] %v1705_v37  ;;  %v425_v16 = vmul.f32 %v1697_v17, %v378_v6  ;;  %v426_v18 = vmul.f32 %v1701_v36, %v378_v6  ;;  %v427_v30 = vmul.f32 %v1705_v37, %v378_v6  ;;  %v444_v46 = vadd.f32 %v420_v38, %v352_v42 }
  0xae   :  { %v445_v47 = vadd.f32 %v421_v39, %v353_v22  ;;  %v446_v48 = vadd.f32 %v422_v40, %v354_v52  ;;  %v447_v49 = vadd.f32 %v423_v41, %v355_v31  ;;  %v448_v50 = vadd.f32 %v424_v19, %v356_v53  ;;  %v2566_v31 = vld [vmem:[#allocation22_spill] sm:$0xff]  ;;  %v2570_v39 = vld [vmem:[#allocation24_spill] sm:$0xff]  ;;  %v2572_v41 = vld [vmem:[#allocation25_spill] sm:$0xff] }
  0xaf   :  { %v449_v51 = vadd.f32 %v425_v16, %v357_v29  ;;  %v450_v2 = vadd.f32 %v426_v18, %v358_v56  ;;  %v451_v3 = vadd.f32 %v427_v30, %v359_v55  ;;  %v336_v4 = vmul.f32 %v1605_v15, %v290_v54  ;;  %v2564_v55 = vld [vmem:[#allocation21_spill] sm:$0xff]  ;;  %v2568_v29 = vld [vmem:[#allocation23_spill] sm:$0xff]  ;;  %v2574_v16 = vld [vmem:[#allocation26_spill] sm:$0xff] }
  0xb0   :  { %v337_v1 = vmul.f32 %v1609_v26, %v290_v54  ;;  %v338_v21 = vmul.f32 %v1613_v24, %v290_v54  ;;  %v339_v12 = vmul.f32 %v1617_v23, %v290_v54  ;;  %v340_v35 = vmul.f32 %v1621_v25, %v290_v54 }
  0xb1   :  { %v341_v6 = vmul.f32 %v1625_v27, %v290_v54  ;;  %v342_v42 = vmul.f32 %v1629_v44, %v290_v54  ;;  %v343_v22 = vmul.f32 %v1633_v45, %v290_v54  ;;  %v1724_v52 = vadd.f32 %v336_v4, %v1587_v28  ;;  %v2576_v28 = vld [vmem:[#allocation27_spill] sm:$0xff]  ;;  %v470_v54 = vpop.permute.xlu0 %469  ;;  %v294_v4 = vpop.permute.xlu1 %293 }
  0xb2   :  { %v1727_v56 = vadd.f32 %v337_v1, %v2564_v55  ;;  %v1730_v53 = vadd.f32 %v338_v21, %v2566_v31  ;;  %v1733_v38 = vadd.f32 %v339_v12, %v2568_v29  ;;  %v1736_v40 = vadd.f32 %v340_v35, %v2570_v39  ;;  %v2578_v1 = vld [vmem:[#allocation9_spill] sm:$0xff] }
  0xb3   :  { %2563 = vst [vmem:[#allocation28_spill] sm:$0xff] %v1724_v52  ;;  %v1739_v19 = vadd.f32 %v341_v6, %v2572_v41  ;;  %v1742_v18 = vadd.f32 %v342_v42, %v2574_v16  ;;  %v1745_v30 = vadd.f32 %v343_v22, %v2576_v28  ;;  %v1749_v21 = vrot.slane %v1467_v57, %v2578_v1 }
  0xb4   :  { %2565 = vst [vmem:[#allocation21_spill] sm:$0xff] %v1727_v56  ;;  %2567 = vst [vmem:[#allocation22_spill] sm:$0xff] %v1730_v53  ;;  %v1753_v12 = vrot.slane %v1469_v58, %v2578_v1  ;;  %v1757_v35 = vrot.slane %v1471_v59, %v2578_v1  ;;  %v1761_v6 = vrot.slane %v1473_v60, %v2578_v1 }
  0xb5   :  { %2569 = vst [vmem:[#allocation23_spill] sm:$0xff] %v1733_v38  ;;  %2571 = vst [vmem:[#allocation24_spill] sm:$0xff] %v1736_v40  ;;  %v1765_v42 = vrot.slane %v1475_v61, %v2578_v1  ;;  %v1769_v22 = vrot.slane %v1477_v62, %v2578_v1  ;;  %v1773_v55 = vrot.slane %v1479_v63, %v2578_v1  ;;  %v382_v37 = vpop.permute.xlu1 %381 }
  0xb6   :  { %2573 = vst [vmem:[#allocation25_spill] sm:$0xff] %v1739_v19  ;;  %2575 = vst [vmem:[#allocation26_spill] sm:$0xff] %v1742_v18  ;;  %v1777_v31 = vrot.slane %v1481_v0, %v2578_v1  ;;  %v512_v29 = vmul.f32 %v1749_v21, %v470_v54  ;;  %v513_v39 = vmul.f32 %v1753_v12, %v470_v54 }
  0xb7   :  { %2577 = vst [vmem:[#allocation27_spill] sm:$0xff] %v1745_v30  ;;  %2579 = vst [vmem:[#allocation9_spill] sm:$0xff] %v1749_v21  ;;  %v514_v41 = vmul.f32 %v1757_v35, %v470_v54  ;;  %v515_v16 = vmul.f32 %v1761_v6, %v470_v54  ;;  %v516_v28 = vmul.f32 %v1765_v42, %v470_v54 }
  0xb8   :  { %2580 = vst [vmem:[#allocation29_spill] sm:$0xff] %v1753_v12  ;;  %2581 = vst [vmem:[#allocation30_spill] sm:$0xff] %v1757_v35  ;;  %v517_v30 = vmul.f32 %v1769_v22, %v470_v54  ;;  %v518_v18 = vmul.f32 %v1773_v55, %v470_v54  ;;  %v519_v19 = vmul.f32 %v1777_v31, %v470_v54 }
  0xb9   :  { %2582 = vst [vmem:[#allocation31_spill] sm:$0xff] %v1761_v6  ;;  %2583 = vst [vmem:[#allocation32_spill] sm:$0xff] %v1765_v42  ;;  %v536_v40 = vadd.f32 %v512_v29, %v444_v46  ;;  %v537_v38 = vadd.f32 %v513_v39, %v445_v47  ;;  %v538_v1 = vadd.f32 %v514_v41, %v446_v48 }
  0xba   :  { %2584 = vst [vmem:[#allocation33_spill] sm:$0xff] %v1769_v22  ;;  %2585 = vst [vmem:[#allocation34_spill] sm:$0xff] %v1773_v55  ;;  %v539_v53 = vadd.f32 %v515_v16, %v447_v49  ;;  %v540_v56 = vadd.f32 %v516_v28, %v448_v50  ;;  %v541_v21 = vadd.f32 %v517_v30, %v449_v51  ;;  %v1851_v51 = vpop.permute.xlu1 %385 }
  0xbb   :  { %v542_v52 = vadd.f32 %v518_v18, %v450_v2  ;;  %v543_v12 = vadd.f32 %v519_v19, %v451_v3  ;;  %v344_v35 = vmul.f32 %v1605_v15, %v294_v4  ;;  %v345_v6 = vmul.f32 %v1609_v26, %v294_v4 }
  0xbc   :  { %v346_v42 = vmul.f32 %v1613_v24, %v294_v4  ;;  %v347_v22 = vmul.f32 %v1617_v23, %v294_v4  ;;  %v348_v55 = vmul.f32 %v1621_v25, %v294_v4  ;;  %v349_v46 = vmul.f32 %v1625_v27, %v294_v4 }
  0xbd   :  { %v350_v47 = vmul.f32 %v1629_v44, %v294_v4  ;;  %v351_v48 = vmul.f32 %v1633_v45, %v294_v4  ;;  %v1796_v49 = vadd.f32 %v344_v35, %v1652_v10  ;;  %v1799_v50 = vadd.f32 %v345_v6, %v1655_v20  ;;  %v562_v44 = vpop.permute.xlu0 %561  ;;  %v2586_v45 = vld [vmem:[#allocation10_spill] sm:$0xff] }
  0xbe   :  { %v1802_v15 = vadd.f32 %v346_v42, %v1658_v9  ;;  %v1805_v26 = vadd.f32 %v347_v22, %v1661_v11  ;;  %v1808_v24 = vadd.f32 %v348_v55, %v1664_v13  ;;  %v1811_v23 = vadd.f32 %v349_v46, %v1667_v14 }
  0xbf   :  { %v1814_v25 = vadd.f32 %v350_v47, %v1670_v43  ;;  %v1817_v27 = vadd.f32 %v351_v48, %v1673_v5  ;;  %v1821_v10 = vrot.slane %v1467_v57, %v2586_v45  ;;  %v1825_v20 = vrot.slane %v1469_v58, %v2586_v45 }
  0xc0   :  { %v1829_v9 = vrot.slane %v1471_v59, %v2586_v45  ;;  %v1833_v11 = vrot.slane %v1473_v60, %v2586_v45  ;;  %v1837_v13 = vrot.slane %v1475_v61, %v2586_v45  ;;  %v1841_v14 = vrot.slane %v1477_v62, %v2586_v45 }
  0xc1   :  { %2587 = vst [vmem:[#allocation10_spill] sm:$0xff] %v1821_v10  ;;  %2588 = vst [vmem:[#allocation35_spill] sm:$0xff] %v1825_v20  ;;  %v1845_v43 = vrot.slane %v1479_v63, %v2586_v45  ;;  %v1849_v5 = vrot.slane %v1481_v0, %v2586_v45  ;;  %v604_v2 = vmul.f32 %v1821_v10, %v562_v44 }
  0xc2   :  { %2589 = vst [vmem:[#allocation36_spill] sm:$0xff] %v1829_v9  ;;  %2590 = vst [vmem:[#allocation37_spill] sm:$0xff] %v1833_v11  ;;  %v605_v3 = vmul.f32 %v1825_v20, %v562_v44  ;;  %v606_v19 = vmul.f32 %v1829_v9, %v562_v44  ;;  %v607_v18 = vmul.f32 %v1833_v11, %v562_v44 }
  0xc3   :  { %2591 = vst [vmem:[#allocation38_spill] sm:$0xff] %v1837_v13  ;;  %2592 = vst [vmem:[#allocation39_spill] sm:$0xff] %v1841_v14  ;;  %v608_v30 = vmul.f32 %v1837_v13, %v562_v44  ;;  %v609_v54 = vmul.f32 %v1841_v14, %v562_v44  ;;  %v610_v4 = vmul.f32 %v1845_v43, %v562_v44 }
  0xc4   :  { %2593 = vst [vmem:[#allocation40_spill] sm:$0xff] %v1845_v43  ;;  %2594 = vst [vmem:[#allocation41_spill] sm:$0xff] %v1849_v5  ;;  %v611_v35 = vmul.f32 %v1849_v5, %v562_v44  ;;  %v628_v6 = vadd.f32 %v604_v2, %v536_v40  ;;  %v629_v42 = vadd.f32 %v605_v3, %v537_v38  ;;  %v2595_v40 = vld [vmem:[#allocation8_spill] sm:$0xff]  ;;  %v2598_v2 = vld [vmem:[#allocation22_spill] sm:$0xff] }
  0xc5   :  { %v630_v22 = vadd.f32 %v606_v19, %v538_v1  ;;  %v631_v55 = vadd.f32 %v607_v18, %v539_v53  ;;  %v632_v29 = vadd.f32 %v608_v30, %v540_v56  ;;  %v633_v39 = vadd.f32 %v609_v54, %v541_v21  ;;  %v1869_v56 = vpop.permute.xlu1 %473  ;;  %v2599_v19 = vld [vmem:[#allocation23_spill] sm:$0xff]  ;;  %v2600_v30 = vld [vmem:[#allocation24_spill] sm:$0xff] }
  0xc6   :  { %v634_v41 = vadd.f32 %v610_v4, %v542_v52  ;;  %v635_v16 = vadd.f32 %v611_v35, %v543_v12  ;;  %v428_v28 = vmul.f32 %v1677_v7, %v382_v37  ;;  %v429_v46 = vmul.f32 %v1681_v8, %v382_v37  ;;  %v2596_v52 = vld [vmem:[#allocation28_spill] sm:$0xff]  ;;  %v2597_v12 = vld [vmem:[#allocation21_spill] sm:$0xff] }
  0xc7   :  { %v430_v47 = vmul.f32 %v1685_v34, %v382_v37  ;;  %v431_v48 = vmul.f32 %v1689_v33, %v382_v37  ;;  %v432_v45 = vmul.f32 %v1693_v32, %v382_v37  ;;  %v433_v44 = vmul.f32 %v1697_v17, %v382_v37  ;;  %v2601_v4 = vld [vmem:[#allocation25_spill] sm:$0xff] }
  0xc8   :  { %v434_v38 = vmul.f32 %v1701_v36, %v382_v37  ;;  %v435_v53 = vmul.f32 %v2595_v40, %v382_v37  ;;  %v1872_v21 = vadd.f32 %v428_v28, %v2596_v52  ;;  %v1875_v1 = vadd.f32 %v429_v46, %v2597_v12  ;;  %v2602_v37 = vld [vmem:[#allocation26_spill] sm:$0xff]  ;;  %v2604_v28 = vld [vmem:[#allocation27_spill] sm:$0xff]  ;;  %v654_v46 = vpop.permute.xlu0 %653 }
  0xc9   :  { %v1878_v3 = vadd.f32 %v430_v47, %v2598_v2  ;;  %v1881_v18 = vadd.f32 %v431_v48, %v2599_v19  ;;  %v1884_v54 = vadd.f32 %v432_v45, %v2600_v30  ;;  %v1887_v35 = vadd.f32 %v433_v44, %v2601_v4  ;;  %v2606_v12 = vld [vmem:[#allocation11_spill] sm:$0xff]  ;;  %v1935_v9 = vpop.permute.xlu1 %477 }
  0xca   :  { %v1890_v5 = vadd.f32 %v434_v38, %v2602_v37  ;;  %v1893_v52 = vadd.f32 %v435_v53, %v2604_v28  ;;  %v1897_v47 = vrot.slane %v1467_v57, %v2606_v12  ;;  %v1901_v48 = vrot.slane %v1469_v58, %v2606_v12 }
  0xcb   :  { %v1905_v45 = vrot.slane %v1471_v59, %v2606_v12  ;;  %v1909_v44 = vrot.slane %v1473_v60, %v2606_v12  ;;  %v1913_v38 = vrot.slane %v1475_v61, %v2606_v12  ;;  %v1917_v53 = vrot.slane %v1477_v62, %v2606_v12 }
  0xcc   :  { %2603 = vst [vmem:[#allocation8_spill] sm:$0xff] %v1890_v5  ;;  %2605 = vst [vmem:[#allocation28_spill] sm:$0xff] %v1893_v52  ;;  %v1921_v2 = vrot.slane %v1479_v63, %v2606_v12  ;;  %v1925_v19 = vrot.slane %v1481_v0, %v2606_v12  ;;  %v696_v30 = vmul.f32 %v1897_v47, %v654_v46 }
  0xcd   :  { %2607 = vst [vmem:[#allocation21_spill] sm:$0xff] %v1897_v47  ;;  %2608 = vst [vmem:[#allocation22_spill] sm:$0xff] %v1901_v48  ;;  %v697_v4 = vmul.f32 %v1901_v48, %v654_v46  ;;  %v698_v37 = vmul.f32 %v1905_v45, %v654_v46  ;;  %v699_v28 = vmul.f32 %v1909_v44, %v654_v46 }
  0xce   :  { %2609 = vst [vmem:[#allocation23_spill] sm:$0xff] %v1905_v45  ;;  %2610 = vst [vmem:[#allocation24_spill] sm:$0xff] %v1909_v44  ;;  %v700_v43 = vmul.f32 %v1913_v38, %v654_v46  ;;  %v701_v14 = vmul.f32 %v1917_v53, %v654_v46  ;;  %v702_v13 = vmul.f32 %v1921_v2, %v654_v46 }
  0xcf   :  { %2611 = vst [vmem:[#allocation25_spill] sm:$0xff] %v1917_v53  ;;  %2612 = vst [vmem:[#allocation26_spill] sm:$0xff] %v1921_v2  ;;  %v703_v11 = vmul.f32 %v1925_v19, %v654_v46  ;;  %v720_v12 = vadd.f32 %v696_v30, %v628_v6  ;;  %v721_v20 = vadd.f32 %v697_v4, %v629_v42  ;;  %v2622_v30 = vld [vmem:[#allocation9_spill] sm:$0xff] }
  0xd0   :  { %v722_v10 = vadd.f32 %v698_v37, %v630_v22  ;;  %v723_v47 = vadd.f32 %v699_v28, %v631_v55  ;;  %v724_v52 = vadd.f32 %v700_v43, %v632_v29  ;;  %v725_v48 = vadd.f32 %v701_v14, %v633_v39  ;;  %v1961_v22 = vpop.permute.xlu1 %565  ;;  %v2623_v37 = vld [vmem:[#allocation29_spill] sm:$0xff] }
  0xd1   :  { %v726_v5 = vadd.f32 %v702_v13, %v634_v41  ;;  %v727_v45 = vadd.f32 %v703_v11, %v635_v16  ;;  %v436_v44 = vmul.f32 %v1677_v7, %v1851_v51  ;;  %v437_v53 = vmul.f32 %v1681_v8, %v1851_v51 }
  0xd2   :  { %v438_v2 = vmul.f32 %v1685_v34, %v1851_v51  ;;  %v439_v46 = vmul.f32 %v1689_v33, %v1851_v51  ;;  %v440_v6 = vmul.f32 %v1693_v32, %v1851_v51  ;;  %v441_v14 = vmul.f32 %v1697_v17, %v1851_v51 }
  0xd3   :  { %v442_v11 = vmul.f32 %v1701_v36, %v1851_v51  ;;  %v443_v7 = vmul.f32 %v2595_v40, %v1851_v51  ;;  %v460_v8 = vadd.f32 %v436_v44, %v1796_v49  ;;  %v461_v13 = vadd.f32 %v437_v53, %v1799_v50  ;;  %v746_v36 = vpop.permute.xlu0 %745  ;;  %v2613_v51 = vld [vmem:[#allocation12_spill] sm:$0xff] }
  0xd4   :  { %v462_v34 = vadd.f32 %v438_v2, %v1802_v15  ;;  %v463_v33 = vadd.f32 %v439_v46, %v1805_v26  ;;  %v464_v43 = vadd.f32 %v440_v6, %v1808_v24  ;;  %v465_v32 = vadd.f32 %v441_v14, %v1811_v23  ;;  %v2003_v2 = vpop.permute.xlu1 %569  ;;  %v2624_v46 = vld [vmem:[#allocation30_spill] sm:$0xff] }
  0xd5   :  { %v466_v17 = vadd.f32 %v442_v11, %v1814_v25  ;;  %v467_v42 = vadd.f32 %v443_v7, %v1817_v27  ;;  %v1965_v49 = vrot.slane %v1467_v57, %v2613_v51  ;;  %v1969_v50 = vrot.slane %v1469_v58, %v2613_v51 }
  0xd6   :  { %v1973_v15 = vrot.slane %v1471_v59, %v2613_v51  ;;  %v1977_v26 = vrot.slane %v1473_v60, %v2613_v51  ;;  %v1981_v24 = vrot.slane %v1475_v61, %v2613_v51  ;;  %v1985_v57 = vrot.slane %v1477_v62, %v2613_v51 }
  0xd7   :  { %2614 = vst [vmem:[#allocation27_spill] sm:$0xff] %v1965_v49  ;;  %2615 = vst [vmem:[#allocation11_spill] sm:$0xff] %v1969_v50  ;;  %v1989_v58 = vrot.slane %v1479_v63, %v2613_v51  ;;  %v1993_v59 = vrot.slane %v1481_v0, %v2613_v51  ;;  %v788_v23 = vmul.f32 %v1965_v49, %v746_v36 }
  0xd8   :  { %2616 = vst [vmem:[#allocation12_spill] sm:$0xff] %v1973_v15  ;;  %2617 = vst [vmem:[#allocation42_spill] sm:$0xff] %v1977_v26  ;;  %v789_v60 = vmul.f32 %v1969_v50, %v746_v36  ;;  %v790_v25 = vmul.f32 %v1973_v15, %v746_v36  ;;  %v791_v61 = vmul.f32 %v1977_v26, %v746_v36 }
  0xd9   :  { %2618 = vst [vmem:[#allocation43_spill] sm:$0xff] %v1981_v24  ;;  %2619 = vst [vmem:[#allocation44_spill] sm:$0xff] %v1985_v57  ;;  %v792_v27 = vmul.f32 %v1981_v24, %v746_v36  ;;  %v793_v62 = vmul.f32 %v1985_v57, %v746_v36  ;;  %v794_v55 = vmul.f32 %v1989_v58, %v746_v36 }
  0xda   :  { %2620 = vst [vmem:[#allocation45_spill] sm:$0xff] %v1989_v58  ;;  %2621 = vst [vmem:[#allocation46_spill] sm:$0xff] %v1993_v59  ;;  %v795_v63 = vmul.f32 %v1993_v59, %v746_v36  ;;  %v812_v29 = vadd.f32 %v788_v23, %v720_v12  ;;  %v813_v39 = vadd.f32 %v789_v60, %v721_v20  ;;  %v2625_v12 = vld [vmem:[#allocation31_spill] sm:$0xff] }
  0xdb   :  { %v814_v0 = vadd.f32 %v790_v25, %v722_v10  ;;  %v815_v41 = vadd.f32 %v791_v61, %v723_v47  ;;  %v816_v16 = vadd.f32 %v792_v27, %v724_v52  ;;  %v817_v40 = vadd.f32 %v793_v62, %v725_v48  ;;  %v2626_v10 = vld [vmem:[#allocation32_spill] sm:$0xff]  ;;  %v2628_v48 = vld [vmem:[#allocation34_spill] sm:$0xff] }
  0xdc   :  { %v818_v44 = vadd.f32 %v794_v55, %v726_v5  ;;  %v819_v53 = vadd.f32 %v795_v63, %v727_v45  ;;  %v520_v4 = vmul.f32 %v2622_v30, %v1869_v56  ;;  %v521_v28 = vmul.f32 %v2623_v37, %v1869_v56  ;;  %v2627_v5 = vld [vmem:[#allocation33_spill] sm:$0xff]  ;;  %v2629_v25 = vld [vmem:[#allocation8_spill] sm:$0xff]  ;;  %v2045_v63 = vpop.permute.xlu1 %657 }
  0xdd   :  { %v522_v6 = vmul.f32 %v2624_v46, %v1869_v56  ;;  %v523_v20 = vmul.f32 %v2625_v12, %v1869_v56  ;;  %v524_v52 = vmul.f32 %v2626_v10, %v1869_v56  ;;  %v525_v47 = vmul.f32 %v2627_v5, %v1869_v56  ;;  %v2630_v27 = vld [vmem:[#allocation28_spill] sm:$0xff] }
  0xde   :  { %v526_v45 = vmul.f32 %v2628_v48, %v1869_v56  ;;  %v527_v14 = vmul.f32 %v1777_v31, %v1869_v56  ;;  %v544_v11 = vadd.f32 %v520_v4, %v1872_v21  ;;  %v545_v7 = vadd.f32 %v521_v28, %v1875_v1 }
  0xdf   :  { %v546_v36 = vadd.f32 %v522_v6, %v1878_v3  ;;  %v547_v51 = vadd.f32 %v523_v20, %v1881_v18  ;;  %v548_v23 = vadd.f32 %v524_v52, %v1884_v54  ;;  %v549_v60 = vadd.f32 %v525_v47, %v1887_v35 }
  0xe0   :  { %v550_v61 = vadd.f32 %v526_v45, %v2629_v25  ;;  %v551_v62 = vadd.f32 %v527_v14, %v2630_v27  ;;  %v528_v55 = vmul.f32 %v2622_v30, %v1935_v9  ;;  %v529_v56 = vmul.f32 %v2623_v37, %v1935_v9  ;;  %v2647_v25 = vld [vmem:[#allocation18_spill] sm:$0xff]  ;;  %v2111_v59 = vpop.permute.xlu1 %661 }
  0xe1   :  { %v530_v21 = vmul.f32 %v2624_v46, %v1935_v9  ;;  %v531_v1 = vmul.f32 %v2625_v12, %v1935_v9  ;;  %v532_v3 = vmul.f32 %v2626_v10, %v1935_v9  ;;  %v533_v18 = vmul.f32 %v2627_v5, %v1935_v9  ;;  %v838_v10 = vpop.permute.xlu0 %837 }
  0xe2   :  { %v534_v54 = vmul.f32 %v2628_v48, %v1935_v9  ;;  %v535_v35 = vmul.f32 %v1777_v31, %v1935_v9  ;;  %v2047_v30 = vadd.f32 %v528_v55, %v460_v8  ;;  %v2049_v4 = vadd.f32 %v529_v56, %v461_v13  ;;  %v2631_v31 = vld [vmem:[#allocation6_spill] sm:$0xff]  ;;  %v2632_v9 = vld [vmem:[#allocation13_spill] sm:$0xff]  ;;  %v2650_v56 = vld [vmem:[#allocation19_spill] sm:$0xff] }
  0xe3   :  { %v2051_v37 = vadd.f32 %v530_v21, %v462_v34  ;;  %v2053_v28 = vadd.f32 %v531_v1, %v463_v33  ;;  %v2055_v46 = vadd.f32 %v532_v3, %v464_v43  ;;  %v2057_v6 = vadd.f32 %v533_v18, %v465_v32  ;;  %v2635_v13 = vld [vmem:[#allocation14_spill] sm:$0xff]  ;;  %v2638_v33 = vld [vmem:[#allocation15_spill] sm:$0xff]  ;;  %v2644_v48 = vld [vmem:[#allocation17_spill] sm:$0xff] }
  0xe4   :  { %v2059_v12 = vadd.f32 %v534_v54, %v466_v17  ;;  %v2061_v20 = vadd.f32 %v535_v35, %v467_v42  ;;  %v2633_v52 = vmax.f32 %v2632_v9, 0.0  ;;  %v2636_v34 = vmax.f32 %v2635_v13, 0.0  ;;  %v2641_v17 = vld [vmem:[#allocation16_spill] sm:$0xff]  ;;  %v2145_v49 = vpop.permute.xlu1 %749 }
  0xe5   :  { %v2639_v43 = vmax.f32 %v2638_v33, 0.0  ;;  %v2642_v42 = vmax.f32 %v2641_v17, 0.0  ;;  %v2645_v45 = vmax.f32 %v2644_v48, 0.0  ;;  %v2648_v27 = vmax.f32 %v2647_v25, 0.0  ;;  %v2653_v3 = vld [vmem:[#allocation20_spill] sm:$0xff]  ;;  %v930_v50 = vpop.permute.xlu0 %929 }
  0xe6   :  { %v2066_v8 = vrot.slane %v2633_v52, %v2631_v31  ;;  %v2071_v5 = vrot.slane %v2636_v34, %v2631_v31  ;;  %v2651_v21 = vmax.f32 %v2650_v56, 0.0  ;;  %v2654_v18 = vmax.f32 %v2653_v3, 0.0 }
  0xe7   :  { %v2076_v32 = vrot.slane %v2639_v43, %v2631_v31  ;;  %v2081_v47 = vrot.slane %v2642_v42, %v2631_v31  ;;  %v2086_v14 = vrot.slane %v2645_v45, %v2631_v31  ;;  %v2091_v55 = vrot.slane %v2648_v27, %v2631_v31 }
  0xe8   :  { %2634 = vst [vmem:[#allocation9_spill] sm:$0xff] %v2066_v8  ;;  %2637 = vst [vmem:[#allocation29_spill] sm:$0xff] %v2071_v5  ;;  %v2096_v1 = vrot.slane %v2651_v21, %v2631_v31  ;;  %v2101_v54 = vrot.slane %v2654_v18, %v2631_v31  ;;  %v880_v35 = vmul.f32 %v2066_v8, %v838_v10 }
  0xe9   :  { %2640 = vst [vmem:[#allocation30_spill] sm:$0xff] %v2076_v32  ;;  %2643 = vst [vmem:[#allocation31_spill] sm:$0xff] %v2081_v47  ;;  %v881_v52 = vmul.f32 %v2071_v5, %v838_v10  ;;  %v882_v34 = vmul.f32 %v2076_v32, %v838_v10  ;;  %v883_v43 = vmul.f32 %v2081_v47, %v838_v10  ;;  %v2656_v47 = vld [vmem:[#allocation10_spill] sm:$0xff] }
  0xea   :  { %2646 = vst [vmem:[#allocation32_spill] sm:$0xff] %v2086_v14  ;;  %2649 = vst [vmem:[#allocation33_spill] sm:$0xff] %v2091_v55  ;;  %v884_v42 = vmul.f32 %v2086_v14, %v838_v10  ;;  %v885_v45 = vmul.f32 %v2091_v55, %v838_v10  ;;  %v886_v27 = vmul.f32 %v2096_v1, %v838_v10  ;;  %v2657_v14 = vld [vmem:[#allocation35_spill] sm:$0xff] }
  0xeb   :  { %2652 = vst [vmem:[#allocation34_spill] sm:$0xff] %v2096_v1  ;;  %2655 = vst [vmem:[#allocation8_spill] sm:$0xff] %v2101_v54  ;;  %v887_v21 = vmul.f32 %v2101_v54, %v838_v10  ;;  %v904_v31 = vadd.f32 %v880_v35, %v812_v29  ;;  %v905_v18 = vadd.f32 %v881_v52, %v813_v39  ;;  %v2658_v1 = vld [vmem:[#allocation36_spill] sm:$0xff]  ;;  %v2659_v10 = vld [vmem:[#allocation37_spill] sm:$0xff] }
  0xec   :  { %v906_v58 = vadd.f32 %v882_v34, %v814_v0  ;;  %v907_v8 = vadd.f32 %v883_v43, %v815_v41  ;;  %v908_v57 = vadd.f32 %v884_v42, %v816_v16  ;;  %v909_v5 = vadd.f32 %v885_v45, %v817_v40  ;;  %v2660_v29 = vld [vmem:[#allocation38_spill] sm:$0xff]  ;;  %v2661_v0 = vld [vmem:[#allocation39_spill] sm:$0xff]  ;;  %v2662_v16 = vld [vmem:[#allocation40_spill] sm:$0xff] }
  0xed   :  { %v910_v24 = vadd.f32 %v886_v27, %v818_v44  ;;  %v911_v32 = vadd.f32 %v887_v21, %v819_v53  ;;  %v612_v26 = vmul.f32 %v2656_v47, %v1961_v22  ;;  %v613_v55 = vmul.f32 %v2657_v14, %v1961_v22  ;;  %v2663_v44 = vld [vmem:[#allocation41_spill] sm:$0xff] }
  0xee   :  { %v614_v15 = vmul.f32 %v2658_v1, %v1961_v22  ;;  %v615_v54 = vmul.f32 %v2659_v10, %v1961_v22  ;;  %v616_v39 = vmul.f32 %v2660_v29, %v1961_v22  ;;  %v617_v41 = vmul.f32 %v2661_v0, %v1961_v22 }
  0xef   :  { %v618_v40 = vmul.f32 %v2662_v16, %v1961_v22  ;;  %v619_v53 = vmul.f32 %v2663_v44, %v1961_v22  ;;  %v2129_v35 = vadd.f32 %v612_v26, %v544_v11  ;;  %v2131_v52 = vadd.f32 %v613_v55, %v545_v7  ;;  %v2664_v22 = vld [vmem:[#allocation7_spill] sm:$0xff] }
  0xf0   :  { %v2133_v34 = vadd.f32 %v614_v15, %v546_v36  ;;  %v2135_v43 = vadd.f32 %v615_v54, %v547_v51  ;;  %v2137_v42 = vadd.f32 %v616_v39, %v548_v23  ;;  %v2139_v45 = vadd.f32 %v617_v41, %v549_v60 }
  0xf1   :  { %v2141_v27 = vadd.f32 %v618_v40, %v550_v61  ;;  %v2143_v21 = vadd.f32 %v619_v53, %v551_v62  ;;  %v2665_v26 = vmax.f32 %v2632_v9, 0.0  ;;  %v2666_v15 = vmax.f32 %v2635_v13, 0.0 }
  0xf2   :  { %v2667_v36 = vmax.f32 %v2638_v33, 0.0  ;;  %v2668_v23 = vmax.f32 %v2641_v17, 0.0  ;;  %v2669_v61 = vmax.f32 %v2644_v48, 0.0  ;;  %v2670_v9 = vmax.f32 %v2647_v25, 0.0 }
  0xf3   :  { %v2150_v11 = vrot.slane %v2665_v26, %v2664_v22  ;;  %v2155_v7 = vrot.slane %v2666_v15, %v2664_v22  ;;  %v2671_v33 = vmax.f32 %v2650_v56, 0.0  ;;  %v2673_v17 = vmax.f32 %v2653_v3, 0.0 }
  0xf4   :  { %v2160_v51 = vrot.slane %v2667_v36, %v2664_v22  ;;  %v2165_v60 = vrot.slane %v2668_v23, %v2664_v22  ;;  %v2170_v62 = vrot.slane %v2669_v61, %v2664_v22  ;;  %v2175_v13 = vrot.slane %v2670_v9, %v2664_v22  ;;  %v2211_v9 = vpop.permute.xlu1 %753 }
  0xf5   :  { %v2180_v55 = vrot.slane %v2671_v33, %v2664_v22  ;;  %v2185_v54 = vrot.slane %v2673_v17, %v2664_v22  ;;  %v972_v39 = vmul.f32 %v2150_v11, %v930_v50  ;;  %v973_v48 = vmul.f32 %v2155_v7, %v930_v50 }
  0xf6   :  { %v974_v41 = vmul.f32 %v2160_v51, %v930_v50  ;;  %v975_v25 = vmul.f32 %v2165_v60, %v930_v50  ;;  %v976_v40 = vmul.f32 %v2170_v62, %v930_v50  ;;  %v977_v53 = vmul.f32 %v2175_v13, %v930_v50 }
  0xf7   :  { %2672 = vst [vmem:[#allocation28_spill] sm:$0xff] %v2180_v55  ;;  %2674 = vst [vmem:[#allocation6_spill] sm:$0xff] %v2185_v54  ;;  %v978_v56 = vmul.f32 %v2180_v55, %v930_v50  ;;  %v979_v26 = vmul.f32 %v2185_v54, %v930_v50  ;;  %v620_v3 = vmul.f32 %v2656_v47, %v2003_v2 }
  0xf8   :  { %v621_v22 = vmul.f32 %v2657_v14, %v2003_v2  ;;  %v622_v15 = vmul.f32 %v2658_v1, %v2003_v2  ;;  %v623_v36 = vmul.f32 %v2659_v10, %v2003_v2  ;;  %v624_v23 = vmul.f32 %v2660_v29, %v2003_v2  ;;  %v2237_v55 = vpop.permute.xlu1 %841 }
  0xf9   :  { %v625_v61 = vmul.f32 %v2661_v0, %v2003_v2  ;;  %v626_v50 = vmul.f32 %v2662_v16, %v2003_v2  ;;  %v627_v47 = vmul.f32 %v2663_v44, %v2003_v2  ;;  %v2214_v14 = vadd.f32 %v620_v3, %v2047_v30 }
  0xfa   :  { %v2217_v1 = vadd.f32 %v621_v22, %v2049_v4  ;;  %v2220_v10 = vadd.f32 %v622_v15, %v2051_v37  ;;  %v2223_v29 = vadd.f32 %v623_v36, %v2053_v28  ;;  %v2226_v0 = vadd.f32 %v624_v23, %v2055_v46  ;;  %v1022_v4 = vpop.permute.xlu0 %1021 }
  0xfb   :  { %v2229_v16 = vadd.f32 %v625_v61, %v2057_v6  ;;  %v2232_v2 = vadd.f32 %v626_v50, %v2059_v12  ;;  %v2235_v30 = vadd.f32 %v627_v47, %v2061_v20  ;;  %v996_v44 = vadd.f32 %v972_v39, %v904_v31  ;;  %v2676_v39 = vld [vmem:[#allocation22_spill] sm:$0xff] }
  0xfc   :  { %v997_v33 = vadd.f32 %v973_v48, %v905_v18  ;;  %v998_v37 = vadd.f32 %v974_v41, %v906_v58  ;;  %v999_v17 = vadd.f32 %v975_v25, %v907_v8  ;;  %v1000_v3 = vadd.f32 %v976_v40, %v908_v57  ;;  %v2677_v41 = vld [vmem:[#allocation23_spill] sm:$0xff]  ;;  %v2678_v40 = vld [vmem:[#allocation24_spill] sm:$0xff] }
  0xfd   :  { %v1001_v28 = vadd.f32 %v977_v53, %v909_v5  ;;  %v1002_v22 = vadd.f32 %v978_v56, %v910_v24  ;;  %v1003_v15 = vadd.f32 %v979_v26, %v911_v32  ;;  %v1032_v46 = vadd.f32 %v1022_v4, %v996_v44  ;;  %v2675_v24 = vld [vmem:[#allocation21_spill] sm:$0xff] }
  0xfe   :  { %v1033_v36 = vadd.f32 %v1022_v4, %v997_v33  ;;  %v1034_v23 = vadd.f32 %v1022_v4, %v998_v37  ;;  %v1035_v6 = vadd.f32 %v1022_v4, %v999_v17  ;;  %v1036_v61 = vadd.f32 %v1022_v4, %v1000_v3  ;;  %v2679_v26 = vld [vmem:[#allocation25_spill] sm:$0xff]  ;;  %v1082_v37 = vpop.permute.xlu0 %1081 }
  0xff   :  { %v1037_v54 = vadd.f32 %v1022_v4, %v1001_v28  ;;  %v1038_v12 = vadd.f32 %v1022_v4, %v1002_v22  ;;  %v1039_v50 = vadd.f32 %v1022_v4, %v1003_v15  ;;  %v1056_v20 = vmax.f32 %v1032_v46, 0.0  ;;  %v2680_v4 = vld [vmem:[#allocation26_spill] sm:$0xff] }
 0x100   :  { %v1057_v47 = vmax.f32 %v1033_v36, 0.0  ;;  %v1058_v31 = vmax.f32 %v1034_v23, 0.0  ;;  %v1059_v18 = vmax.f32 %v1035_v6, 0.0  ;;  %v1060_v58 = vmax.f32 %v1036_v61, 0.0  ;;  %v2263_v6 = vpop.permute.xlu1 %845 }
 0x101   :  { %v1061_v8 = vmax.f32 %v1037_v54, 0.0  ;;  %v1062_v57 = vmax.f32 %v1038_v12, 0.0  ;;  %v1063_v5 = vmax.f32 %v1039_v50, 0.0  ;;  %v704_v32 = vmul.f32 %v2675_v24, %v2045_v63 }
 0x102   :  { %v705_v48 = vmul.f32 %v2676_v39, %v2045_v63  ;;  %v706_v25 = vmul.f32 %v2677_v41, %v2045_v63  ;;  %v707_v53 = vmul.f32 %v2678_v40, %v2045_v63  ;;  %v708_v56 = vmul.f32 %v1913_v38, %v2045_v63 }
 0x103   :  { %v709_v54 = vmul.f32 %v2679_v26, %v2045_v63  ;;  %v710_v44 = vmul.f32 %v2680_v4, %v2045_v63  ;;  %v711_v33 = vmul.f32 %v1925_v19, %v2045_v63  ;;  %v728_v17 = vadd.f32 %v704_v32, %v2129_v35 }
 0x104   :  { %v729_v3 = vadd.f32 %v705_v48, %v2131_v52  ;;  %v730_v28 = vadd.f32 %v706_v25, %v2133_v34  ;;  %v731_v22 = vadd.f32 %v707_v53, %v2135_v43  ;;  %v732_v15 = vadd.f32 %v708_v56, %v2137_v42  ;;  %v2305_v48 = vpop.permute.xlu1 %933  ;;  %v2688_v56 = vld [vmem:[#allocation46_spill] sm:$0xff] }
 0x105   :  { %v733_v46 = vadd.f32 %v709_v54, %v2139_v45  ;;  %v734_v36 = vadd.f32 %v710_v44, %v2141_v27  ;;  %v735_v23 = vadd.f32 %v711_v33, %v2143_v21  ;;  %v2265_v63 = vmul.f32 %v1082_v37, %v1056_v20 }
 0x106   :  { %v2267_v61 = vmul.f32 %v1082_v37, %v1057_v47  ;;  %v2269_v35 = vmul.f32 %v1082_v37, %v1058_v31  ;;  %v2271_v52 = vmul.f32 %v1082_v37, %v1059_v18  ;;  %v2273_v34 = vmul.f32 %v1082_v37, %v1060_v58 }
 0x107   :  { %v2275_v43 = vmul.f32 %v1082_v37, %v1061_v8  ;;  %v2277_v42 = vmul.f32 %v1082_v37, %v1062_v57  ;;  %v2279_v45 = vmul.f32 %v1082_v37, %v1063_v5  ;;  %v712_v27 = vmul.f32 %v2675_v24, %v2111_v59 }
 0x108   :  { %v713_v21 = vmul.f32 %v2676_v39, %v2111_v59  ;;  %v714_v12 = vmul.f32 %v2677_v41, %v2111_v59  ;;  %v715_v50 = vmul.f32 %v2678_v40, %v2111_v59  ;;  %v716_v20 = vmul.f32 %v1913_v38, %v2111_v59  ;;  %v2687_v40 = vld [vmem:[#allocation45_spill] sm:$0xff] }
 0x109   :  { %v717_v47 = vmul.f32 %v2679_v26, %v2111_v59  ;;  %v718_v31 = vmul.f32 %v2680_v4, %v2111_v59  ;;  %v719_v18 = vmul.f32 %v1925_v19, %v2111_v59  ;;  %v736_v58 = vadd.f32 %v712_v27, %v2214_v14  ;;  %v2681_v19 = vld [vmem:[#allocation27_spill] sm:$0xff] }
 0x10a   :  { %v737_v8 = vadd.f32 %v713_v21, %v2217_v1  ;;  %v738_v57 = vadd.f32 %v714_v12, %v2220_v10  ;;  %v739_v5 = vadd.f32 %v715_v50, %v2223_v29  ;;  %v740_v24 = vadd.f32 %v716_v20, %v2226_v0  ;;  %v2682_v14 = vld [vmem:[#allocation11_spill] sm:$0xff]  ;;  %v2683_v10 = vld [vmem:[#allocation12_spill] sm:$0xff]  ;;  %v2684_v29 = vld [vmem:[#allocation42_spill] sm:$0xff] }
 0x10b   :  { %v741_v38 = vadd.f32 %v717_v47, %v2229_v16  ;;  %v742_v32 = vadd.f32 %v718_v31, %v2232_v2  ;;  %v743_v39 = vadd.f32 %v719_v18, %v2235_v30  ;;  %v796_v59 = vmul.f32 %v2681_v19, %v2145_v49  ;;  %v2685_v16 = vld [vmem:[#allocation43_spill] sm:$0xff]  ;;  %v2686_v2 = vld [vmem:[#allocation44_spill] sm:$0xff] }
 0x10c   :  { %v797_v1 = vmul.f32 %v2682_v14, %v2145_v49  ;;  %v798_v41 = vmul.f32 %v2683_v10, %v2145_v49  ;;  %v799_v0 = vmul.f32 %v2684_v29, %v2145_v49  ;;  %v800_v25 = vmul.f32 %v2685_v16, %v2145_v49 }
 0x10d   :  { %v801_v30 = vmul.f32 %v2686_v2, %v2145_v49  ;;  %v802_v53 = vmul.f32 %v2687_v40, %v2145_v49  ;;  %v803_v26 = vmul.f32 %v2688_v56, %v2145_v49  ;;  %v820_v54 = vadd.f32 %v796_v59, %v728_v17 }
 0x10e   :  { %v821_v4 = vadd.f32 %v797_v1, %v729_v3  ;;  %v822_v44 = vadd.f32 %v798_v41, %v730_v28  ;;  %v823_v33 = vadd.f32 %v799_v0, %v731_v22  ;;  %v824_v37 = vadd.f32 %v800_v25, %v732_v15  ;;  %v938_v15 = vpop.permute.xlu1 %937  ;;  %v2689_v1 = vld [vmem:[#allocation9_spill] sm:$0xff]  ;;  %v2691_v0 = vld [vmem:[#allocation30_spill] sm:$0xff] }
 0x10f   :  { %v825_v27 = vadd.f32 %v801_v30, %v733_v46  ;;  %v826_v21 = vadd.f32 %v802_v53, %v734_v36  ;;  %v827_v12 = vadd.f32 %v803_v26, %v735_v23  ;;  %v804_v50 = vmul.f32 %v2681_v19, %v2211_v9  ;;  %v2690_v41 = vld [vmem:[#allocation29_spill] sm:$0xff] }
 0x110   :  { %v805_v20 = vmul.f32 %v2682_v14, %v2211_v9  ;;  %v806_v47 = vmul.f32 %v2683_v10, %v2211_v9  ;;  %v807_v49 = vmul.f32 %v2684_v29, %v2211_v9  ;;  %v808_v17 = vmul.f32 %v2685_v16, %v2211_v9 }
 0x111   :  { %v809_v3 = vmul.f32 %v2686_v2, %v2211_v9  ;;  %v810_v28 = vmul.f32 %v2687_v40, %v2211_v9  ;;  %v811_v22 = vmul.f32 %v2688_v56, %v2211_v9  ;;  %v828_v46 = vadd.f32 %v804_v50, %v736_v58  ;;  %v2692_v9 = vld [vmem:[#allocation31_spill] sm:$0xff]  ;;  %v2693_v58 = vld [vmem:[#allocation32_spill] sm:$0xff] }
 0x112   :  { %v829_v36 = vadd.f32 %v805_v20, %v737_v8  ;;  %v830_v23 = vadd.f32 %v806_v47, %v738_v57  ;;  %v831_v31 = vadd.f32 %v807_v49, %v739_v5  ;;  %v832_v18 = vadd.f32 %v808_v17, %v740_v24  ;;  %v2694_v57 = vld [vmem:[#allocation33_spill] sm:$0xff]  ;;  %v2695_v24 = vld [vmem:[#allocation34_spill] sm:$0xff]  ;;  %v1026_v47 = vpop.permute.xlu1 %1025 }
 0x113   :  { %v833_v19 = vadd.f32 %v809_v3, %v741_v38  ;;  %v834_v59 = vadd.f32 %v810_v28, %v742_v32  ;;  %v835_v14 = vadd.f32 %v811_v22, %v743_v39  ;;  %v888_v10 = vmul.f32 %v2689_v1, %v2237_v55  ;;  %v2696_v32 = vld [vmem:[#allocation8_spill] sm:$0xff] }
 0x114   :  { %v889_v29 = vmul.f32 %v2690_v41, %v2237_v55  ;;  %v890_v16 = vmul.f32 %v2691_v0, %v2237_v55  ;;  %v891_v25 = vmul.f32 %v2692_v9, %v2237_v55  ;;  %v892_v8 = vmul.f32 %v2693_v58, %v2237_v55 }
 0x115   :  { %v893_v5 = vmul.f32 %v2694_v57, %v2237_v55  ;;  %v894_v38 = vmul.f32 %v2695_v24, %v2237_v55  ;;  %v895_v39 = vmul.f32 %v2696_v32, %v2237_v55  ;;  %v912_v2 = vadd.f32 %v888_v10, %v820_v54 }
 0x116   :  { %v913_v30 = vadd.f32 %v889_v29, %v821_v4  ;;  %v914_v40 = vadd.f32 %v890_v16, %v822_v44  ;;  %v915_v53 = vadd.f32 %v891_v25, %v823_v33  ;;  %v916_v56 = vadd.f32 %v892_v8, %v824_v37 }
 0x117   :  { %v917_v26 = vadd.f32 %v893_v5, %v825_v27  ;;  %v918_v50 = vadd.f32 %v894_v38, %v826_v21  ;;  %v919_v20 = vadd.f32 %v895_v39, %v827_v12  ;;  %v896_v49 = vmul.f32 %v2689_v1, %v2263_v6 }
 0x118   :  { %v897_v17 = vmul.f32 %v2690_v41, %v2263_v6  ;;  %v898_v3 = vmul.f32 %v2691_v0, %v2263_v6  ;;  %v899_v55 = vmul.f32 %v2692_v9, %v2263_v6  ;;  %v900_v54 = vmul.f32 %v2693_v58, %v2263_v6 }
 0x119   :  { %v901_v4 = vmul.f32 %v2694_v57, %v2263_v6  ;;  %v902_v44 = vmul.f32 %v2695_v24, %v2263_v6  ;;  %v903_v33 = vmul.f32 %v2696_v32, %v2263_v6  ;;  %v920_v37 = vadd.f32 %v896_v49, %v828_v46 }
 0x11a   :  { %v921_v27 = vadd.f32 %v897_v17, %v829_v36  ;;  %v922_v21 = vadd.f32 %v898_v3, %v830_v23  ;;  %v923_v12 = vadd.f32 %v899_v55, %v831_v31  ;;  %v924_v28 = vadd.f32 %v900_v54, %v832_v18  ;;  %v2697_v23 = vld [vmem:[#allocation28_spill] sm:$0xff]  ;;  %v2698_v18 = vld [vmem:[#allocation6_spill] sm:$0xff] }
 0x11b   :  { %v925_v22 = vadd.f32 %v901_v4, %v833_v19  ;;  %v926_v1 = vadd.f32 %v902_v44, %v834_v59  ;;  %v927_v10 = vadd.f32 %v903_v33, %v835_v14  ;;  %v980_v41 = vmul.f32 %v2150_v11, %v2305_v48  ;;  %v1030_v59 = vpop.permute.xlu1 %1029 }
 0x11c   :  { %v981_v29 = vmul.f32 %v2155_v7, %v2305_v48  ;;  %v982_v0 = vmul.f32 %v2160_v51, %v2305_v48  ;;  %v983_v6 = vmul.f32 %v2165_v60, %v2305_v48  ;;  %v984_v46 = vmul.f32 %v2170_v62, %v2305_v48 }
 0x11d   :  { %v985_v36 = vmul.f32 %v2175_v13, %v2305_v48  ;;  %v986_v31 = vmul.f32 %v2697_v23, %v2305_v48  ;;  %v987_v19 = vmul.f32 %v2698_v18, %v2305_v48  ;;  %v988_v14 = vmul.f32 %v2150_v11, %v938_v15 }
 0x11e   :  { %v989_v16 = vmul.f32 %v2155_v7, %v938_v15  ;;  %v990_v9 = vmul.f32 %v2160_v51, %v938_v15  ;;  %v991_v25 = vmul.f32 %v2165_v60, %v938_v15  ;;  %v992_v58 = vmul.f32 %v2170_v62, %v938_v15 }
 0x11f   :  { %v993_v8 = vmul.f32 %v2175_v13, %v938_v15  ;;  %v994_v57 = vmul.f32 %v2697_v23, %v938_v15  ;;  %v995_v5 = vmul.f32 %v2698_v18, %v938_v15  ;;  %v1004_v24 = vadd.f32 %v980_v41, %v912_v2  ;;  %v1086_v4 = vpop.permute.xlu1 %1085 }
 0x120   :  { %v1005_v38 = vadd.f32 %v981_v29, %v913_v30  ;;  %v1006_v48 = vadd.f32 %v982_v0, %v914_v40  ;;  %v1007_v32 = vadd.f32 %v983_v6, %v915_v53  ;;  %v1008_v39 = vadd.f32 %v984_v46, %v916_v56 }
 0x121   :  { %v1009_v11 = vadd.f32 %v985_v36, %v917_v26  ;;  %v1010_v49 = vadd.f32 %v986_v31, %v918_v50  ;;  %v1011_v7 = vadd.f32 %v987_v19, %v919_v20  ;;  %v1040_v17 = vadd.f32 %v1026_v47, %v1004_v24 }
 0x122   :  { %v1041_v51 = vadd.f32 %v1026_v47, %v1005_v38  ;;  %v1042_v3 = vadd.f32 %v1026_v47, %v1006_v48  ;;  %v1043_v60 = vadd.f32 %v1026_v47, %v1007_v32  ;;  %v1044_v55 = vadd.f32 %v1026_v47, %v1008_v39 }
 0x123   :  { %v1045_v62 = vadd.f32 %v1026_v47, %v1009_v11  ;;  %v1046_v54 = vadd.f32 %v1026_v47, %v1010_v49  ;;  %v1047_v13 = vadd.f32 %v1026_v47, %v1011_v7  ;;  %v1064_v44 = vmax.f32 %v1040_v17, 0.0  ;;  %v1090_v11 = vpop.permute.xlu1 %1089 }
 0x124   :  { %v1065_v33 = vmax.f32 %v1041_v51, 0.0  ;;  %v1066_v15 = vmax.f32 %v1042_v3, 0.0  ;;  %v1067_v2 = vmax.f32 %v1043_v60, 0.0  ;;  %v1068_v30 = vmax.f32 %v1044_v55, 0.0 }
 0x125   :  { %v1069_v40 = vmax.f32 %v1045_v62, 0.0  ;;  %v1070_v53 = vmax.f32 %v1046_v54, 0.0  ;;  %v1071_v56 = vmax.f32 %v1047_v13, 0.0  ;;  %v1100_v26 = vmul.f32 %v1086_v4, %v1064_v44 }
 0x126   :  { %v1101_v50 = vmul.f32 %v1086_v4, %v1065_v33  ;;  %v1102_v20 = vmul.f32 %v1086_v4, %v1066_v15  ;;  %v1103_v41 = vmul.f32 %v1086_v4, %v1067_v2  ;;  %v1104_v29 = vmul.f32 %v1086_v4, %v1068_v30 }
 0x127   :  { %v1105_v0 = vmul.f32 %v1086_v4, %v1069_v40  ;;  %v1106_v6 = vmul.f32 %v1086_v4, %v1070_v53  ;;  %v1107_v46 = vmul.f32 %v1086_v4, %v1071_v56  ;;  %v1012_v36 = vadd.f32 %v988_v14, %v920_v37 }
 0x128   :  { %v1013_v47 = vadd.f32 %v989_v16, %v921_v27  ;;  %v1014_v23 = vadd.f32 %v990_v9, %v922_v21  ;;  %v1015_v31 = vadd.f32 %v991_v25, %v923_v12  ;;  %v1016_v18 = vadd.f32 %v992_v58, %v924_v28 }
 0x129   :  { %v1017_v19 = vadd.f32 %v993_v8, %v925_v22  ;;  %v1018_v24 = vadd.f32 %v994_v57, %v926_v1  ;;  %v1019_v38 = vadd.f32 %v995_v5, %v927_v10  ;;  %v1048_v48 = vadd.f32 %v1030_v59, %v1012_v36 }
 0x12a   :  { %v1049_v32 = vadd.f32 %v1030_v59, %v1013_v47  ;;  %v1050_v39 = vadd.f32 %v1030_v59, %v1014_v23  ;;  %v1051_v49 = vadd.f32 %v1030_v59, %v1015_v31  ;;  %v1052_v7 = vadd.f32 %v1030_v59, %v1016_v18 }
 0x12b   :  { %v1053_v17 = vadd.f32 %v1030_v59, %v1017_v19  ;;  %v1054_v51 = vadd.f32 %v1030_v59, %v1018_v24  ;;  %v1055_v3 = vadd.f32 %v1030_v59, %v1019_v38  ;;  %v1072_v60 = vmax.f32 %v1048_v48, 0.0 }
 0x12c   :  { %v1073_v55 = vmax.f32 %v1049_v32, 0.0  ;;  %v1074_v62 = vmax.f32 %v1050_v39, 0.0  ;;  %v1075_v37 = vmax.f32 %v1051_v49, 0.0  ;;  %v1076_v27 = vmax.f32 %v1052_v7, 0.0 }
 0x12d   :  { %v1077_v21 = vmax.f32 %v1053_v17, 0.0  ;;  %v1078_v12 = vmax.f32 %v1054_v51, 0.0  ;;  %v1079_v28 = vmax.f32 %v1055_v3, 0.0  ;;  %v1108_v22 = vmul.f32 %v1090_v11, %v1072_v60 }
 0x12e   :  { %v1109_v1 = vmul.f32 %v1090_v11, %v1073_v55  ;;  %v1110_v10 = vmul.f32 %v1090_v11, %v1074_v62  ;;  %v1111_v14 = vmul.f32 %v1090_v11, %v1075_v37  ;;  %v1112_v16 = vmul.f32 %v1090_v11, %v1076_v27 }
 0x12f   :  { %v1113_v9 = vmul.f32 %v1090_v11, %v1077_v21  ;;  %v1114_v25 = vmul.f32 %v1090_v11, %v1078_v12  ;;  %v1115_v58 = vmul.f32 %v1090_v11, %v1079_v28  ;;  %v1116_v8 = vadd.f32 %v1100_v26, %v2265_v63  ;;  %v1191_v28 = vpop.permute.xlu0 %1190 }
 0x130   :  { %v1118_v59 = vsel %vm1117_vm0, %v1108_v22, 0.0  ;;  %v1126_v57 = vadd.f32 %v1101_v50, %v2267_v61  ;;  %v1127_v5 = vsel %vm1117_vm0, %v1109_v1, 0.0  ;;  %v1135_v54 = vadd.f32 %v1102_v20, %v2269_v35 }
 0x131   :  { %v1136_v13 = vsel %vm1117_vm0, %v1110_v10, 0.0  ;;  %v1144_v4 = vadd.f32 %v1103_v41, %v2271_v52  ;;  %v1119_v44 = vadd.f32 %v1118_v59, %v1116_v8  ;;  %v1145_v15 = vsel %vm1117_vm0, %v1111_v14, 0.0 }
 0x132   :  { %v1128_v33 = vadd.f32 %v1127_v5, %v1126_v57  ;;  %v1153_v2 = vadd.f32 %v1104_v29, %v2273_v34  ;;  %v1137_v30 = vadd.f32 %v1136_v13, %v1135_v54  ;;  %v1154_v40 = vsel %vm1117_vm0, %v1112_v16, 0.0 }
 0x133   :  { %v1146_v63 = vadd.f32 %v1145_v15, %v1144_v4  ;;  %v1162_v61 = vadd.f32 %v1105_v0, %v2275_v43  ;;  %v1163_v56 = vsel %vm1117_vm0, %v1113_v9, 0.0  ;;  %v1171_v35 = vadd.f32 %v1106_v6, %v2277_v42 }
 0x134   :  { %v1155_v53 = vadd.f32 %v1154_v40, %v1153_v2  ;;  %v1172_v26 = vsel %vm1117_vm0, %v1114_v25, 0.0  ;;  %v1180_v50 = vadd.f32 %v1107_v46, %v2279_v45  ;;  %v1181_v20 = vsel %vm1117_vm0, %v1115_v58, 0.0 }
 0x135   :  { %v1164_v52 = vadd.f32 %v1163_v56, %v1162_v61  ;;  %v1120_v41 = vrot.slane %v1119_v44, 4  ;;  %v1173_v34 = vadd.f32 %v1172_v26, %v1171_v35  ;;  %v1129_v29 = vrot.slane %v1128_v33, 4 }
 0x136   :  { %v1138_v36 = vrot.slane %v1137_v30, 4  ;;  %v1147_v47 = vrot.slane %v1146_v63, 4  ;;  %v1182_v23 = vadd.f32 %v1181_v20, %v1180_v50  ;;  %v1156_v43 = vrot.slane %v1155_v53, 4 }
 0x137   :  { %v1121_v31 = vadd.f32 %v1120_v41, %v1119_v44  ;;  %v1165_v0 = vrot.slane %v1164_v52, 4  ;;  %v1130_v18 = vadd.f32 %v1129_v29, %v1128_v33  ;;  %v1174_v42 = vrot.slane %v1173_v34, 4  ;;  %v2699_v29 = vld [vmem:[#allocation5_spill] sm:$0xff] }
 0x138   :  { %v1139_v19 = vadd.f32 %v1138_v36, %v1137_v30  ;;  %v1148_v24 = vadd.f32 %v1147_v47, %v1146_v63  ;;  %v1157_v38 = vadd.f32 %v1156_v43, %v1155_v53  ;;  %v1183_v32 = vrot.slane %v1182_v23, 4 }
 0x139   :  { %v1122_v6 = vrot.slane %v1121_v31, 2  ;;  %v1166_v48 = vadd.f32 %v1165_v0, %v1164_v52  ;;  %v1131_v45 = vrot.slane %v1130_v18, 2  ;;  %v1175_v11 = vadd.f32 %v1174_v42, %v1173_v34 }
 0x13a   :  { %v1140_v46 = vrot.slane %v1139_v19, 2  ;;  %v1149_v39 = vrot.slane %v1148_v24, 2  ;;  %v1158_v7 = vrot.slane %v1157_v38, 2  ;;  %v1184_v51 = vadd.f32 %v1183_v32, %v1182_v23 }
 0x13b   :  { %v1123_v49 = vadd.f32 %v1122_v6, %v1121_v31  ;;  %v1167_v17 = vrot.slane %v1166_v48, 2  ;;  %v1132_v3 = vadd.f32 %v1131_v45, %v1130_v18  ;;  %v1176_v62 = vrot.slane %v1175_v11, 2 }
 0x13c   :  { %v1141_v60 = vadd.f32 %v1140_v46, %v1139_v19  ;;  %v1150_v55 = vadd.f32 %v1149_v39, %v1148_v24  ;;  %v1159_v27 = vadd.f32 %v1158_v7, %v1157_v38  ;;  %v1185_v12 = vrot.slane %v1184_v51, 2 }
 0x13d   :  { %v1124_v37 = vrot.slane %v1123_v49, 1  ;;  %v1168_v21 = vadd.f32 %v1167_v17, %v1166_v48  ;;  %v1133_v22 = vrot.slane %v1132_v3, 1  ;;  %v1177_v14 = vadd.f32 %v1176_v62, %v1175_v11 }
 0x13e   :  { %v1142_v1 = vrot.slane %v1141_v60, 1  ;;  %v1151_v10 = vrot.slane %v1150_v55, 1  ;;  %v1160_v9 = vrot.slane %v1159_v27, 1  ;;  %v1186_v58 = vadd.f32 %v1185_v12, %v1184_v51 }
 0x13f   :  { %v1125_v16 = vadd.f32 %v1124_v37, %v1123_v49  ;;  %v1169_v25 = vrot.slane %v1168_v21, 1  ;;  %v1134_v8 = vadd.f32 %v1133_v22, %v1132_v3  ;;  %v1178_v5 = vrot.slane %v1177_v14, 1 }
 0x140   :  { %v1143_v59 = vadd.f32 %v1142_v1, %v1141_v60  ;;  %v1152_v57 = vadd.f32 %v1151_v10, %v1150_v55  ;;  %v1161_v54 = vadd.f32 %v1160_v9, %v1159_v27  ;;  %v1187_v4 = vrot.slane %v1186_v58, 1 }
 0x141   :  { %v1170_v13 = vadd.f32 %v1169_v25, %v1168_v21  ;;  %v1193_v44 = vadd.f32 %v1191_v28, %v1125_v16  ;;  %v1179_v33 = vadd.f32 %v1178_v5, %v1177_v14  ;;  %v1194_v15 = vadd.f32 %v1191_v28, %v1134_v8 }
 0x142   :  { %v1195_v2 = vadd.f32 %v1191_v28, %v1143_v59  ;;  %v1196_v30 = vadd.f32 %v1191_v28, %v1152_v57  ;;  %v1188_v63 = vadd.f32 %v1187_v4, %v1186_v58  ;;  %v1197_v40 = vadd.f32 %v1191_v28, %v1161_v54 }
 0x143   :  { %v1198_v61 = vadd.f32 %v1191_v28, %v1170_v13  ;;  %v1199_v53 = vadd.f32 %v1191_v28, %v1179_v33  ;;  %v1209_v56 = vcombine.low %v1193_v44, %v1194_v15  ;;  %v1357_v26 = vmov 1966171168  }
 0x144   :  { %v1210_v35 = vcombine.low %v1195_v2, %v1196_v30  ;;  %v1214_v52 = vunpack.c.l.s4 %v1357_v26  ;;  %v1200_v50 = vadd.f32 %v1191_v28, %v1188_v63 }
 0x145   :  { %v1211_v20 = vcombine.low %v1197_v40, %v1198_v61 }
 0x146   :  { %v1215_v41 = vunpack.c.0.s8 %v1214_v52  ;;  %v1212_v34 = vcombine.low %v1199_v53, %v1200_v50 }
 0x148   :  { %v1218_v36 = vsub.s32 %v1215_v41, %v2699_v29 }
 0x14a   :  { %v1219_v47 = vrot.slane %v1209_v56, %v1218_v36  ;;  %v1226_v23 = vrot.slane %v1210_v35, %v1218_v36  ;;  %v1233_v31 = vrot.slane %v1211_v20, %v1218_v36  ;;  %v1240_v43 = vrot.slane %v1212_v34, %v1218_v36 }
 0x14c   :  { %v1241_v0 = vcombine.low %v1219_v47, %v1226_v23  ;;  %v1242_v18 = vcombine.low %v1233_v31, %v1240_v43 }
 0x14e   :  { %v1249_v19 = vrot.slane %v1241_v0, %v1218_v36  ;;  %v1256_v24 = vrot.slane %v1242_v18, %v1218_v36 }
 0x150   :  { %v1257_v42 = vcombine.low %v1249_v19, %v1256_v24 }
 0x152   :  { %1259 = vst [vmem:[#allocation2] sm:$0xff] %v1257_v42 }
 0x153   :  { %1329 = shalt.err (!%p1326_p4)
}
 0x154   :  { %s1330_s20 = scalar_lea.hbm %s2426_s2, 128 }
 0x155   :  { %p1331_p5 = scmp.ne.s32.totalorder %s2426_s2, %s1330_s20  ;;  %p1334_p6 = scmp.lt.u32.totalorder %s1330_s20, %s2426_s2 }
 0x157   :  { %p1336_p7 = pnand %p1334_p6, %p1331_p5 }
 0x159   :  { %1339 = shalt.err (!%p1336_p7)
}
 0x15a   :  { %1269 = dma.vmem_to_hbm [thread:$0]  %s1267_s16, 128, %s2426_s2, [#allocation3]  }
 0x15b   :  { %1340 = dma.done.wait [#allocation3], 128  }
 0x15c   :  { %1341 = vsyncadd [#allocation3], 4294967168 }
 0x15d   :  { %1273 = vsyncpa [#allocation3], 1 }

</bundles_post_ra>
